<compile_context>
chip_gen: v7x
topology: tpu7x:2x2x1
jax: 0.10.0
libtpu: 0.0.40
codegen_flags: <defaults>
</compile_context>

<pallas_src>
import jax
import jax.numpy as jnp
from jax.experimental import pallas as pl
from jax.experimental.pallas import tpu as pltpu

_NEG_BIG = -1e30  # finite "-inf": avoids inf-inf NaNs in the online softmax

_ACTS = {
    "relu": lambda v: jnp.maximum(v, 0.0),
    "gelu": jax.nn.gelu,
    "tanh": jnp.tanh,
}


def _make_attention_kernel(n_valid, tile_n, d, gated, act):
    act_fn = _ACTS[act]

    def kernel(x_ref, w_ref, wc_ref, out_ref, scores_ref, m_ref, l_ref,
               m_sc, l_sc, acc_sc):
        pid = pl.program_id(0)

        @pl.when(pid == 0)
        def _init():
            m_sc[...] = jnp.full_like(m_sc, _NEG_BIG)
            l_sc[...] = jnp.zeros_like(l_sc)
            acc_sc[...] = jnp.zeros_like(acc_sc)

        # MXU matmul in the streaming dtype (bf16 by default); f32 accumulate.
        x = x_ref[...]                                                  # [T, L]
        h = jnp.dot(x, w_ref[...], preferred_element_type=jnp.float32)

        if gated:                                                       # [T, 2D]
            g = act_fn(h[:, :d]) * jax.nn.sigmoid(h[:, d:])             # [T, D]
        else:                                                           # [T, D]
            g = act_fn(h)

        # attention_c (Linear(D, 1)): VPU multiply + lane reduction.
        wc = wc_ref[...].astype(jnp.float32)                            # [1, D]
        s = jnp.sum(g * wc, axis=-1, keepdims=True)                     # [T, 1]

        # Validity mask for the ragged last tile: x is NOT padded in HBM, so
        # rows >= n_valid of the final block hold undefined VMEM data.
        row = pid * tile_n + jax.lax.broadcasted_iota(jnp.int32, (tile_n, 1), 0)
        valid = row < n_valid                                           # [T, 1]
        s = jnp.where(valid, s, _NEG_BIG)

        # Raw scores (A_ori) as a column; the wrapper transposes to [1, N].
        # Out-of-range rows of the last block are dropped by Pallas on write-back.
        scores_ref[...] = s.astype(scores_ref.dtype)

        # Online softmax + weighted feature accumulation over N.
        m_prev = m_sc[...]                                              # [1, 1]
        m_new = jnp.maximum(m_prev, jnp.max(s, axis=(0, 1), keepdims=True))
        alpha = jnp.exp(m_prev - m_new)                                 # [1, 1]
        p = jnp.exp(s - m_new)                                          # [T, 1], exactly 0 on invalid rows
        l_sc[...] = alpha * l_sc[...] + jnp.sum(p, axis=(0, 1), keepdims=True)
        # Mask the product (not just p): tail-row garbage can be NaN/Inf and
        # 0 * NaN would otherwise corrupt the accumulator.
        contrib = jnp.where(valid, p * x.astype(jnp.float32), 0.0)      # [T, L]
        acc_sc[...] = alpha * acc_sc[...] + jnp.sum(contrib, axis=0, keepdims=True)
        m_sc[...] = m_new

        @pl.when(pid == pl.num_programs(0) - 1)
        def _finalize():
            out_ref[...] = (acc_sc[...] / l_sc[...]).astype(out_ref.dtype)
            m_ref[...] = m_sc[...]
            l_ref[...] = l_sc[...]

    return kernel


def _attention_pallas(x, w_fused, wc, *, gated, act, tile_n, compute_dtype):
    n, l = x.shape
    k, d = wc.shape
    assert k == 1, "DAttention uses K == 1"
    assert tile_n % 8 == 0, "tile_n must be a multiple of 8 (sublane)"
    wdim = 2 * d if gated else d
    assert w_fused.shape == (l, wdim)
    if gated:
        assert d % 128 == 0, "gated path slices h at lane index d; D must be a multiple of 128"

    # Stream x / weights in the compute dtype (bf16 by default); accumulation
    # stays f32 and the pooled feature output is returned in f32.
    if compute_dtype is not None:
        x = x.astype(compute_dtype)
        w_fused = w_fused.astype(compute_dtype)
        wc = wc.astype(compute_dtype)

    n_tiles = pl.cdiv(n, tile_n)
    kernel = _make_attention_kernel(n, tile_n, d, gated, act)

    out, scores_col, m_fin, l_fin = pl.pallas_call(
        kernel,
        grid=(n_tiles,),
        in_specs=[
            pl.BlockSpec((tile_n, l), lambda i: (i, 0)),   # x: streamed/pipelined
            pl.BlockSpec((l, wdim), lambda i: (0, 0)),     # fused W: resident
            pl.BlockSpec((1, d), lambda i: (0, 0)),        # wc: resident
        ],
        out_specs=[
            pl.BlockSpec((1, l), lambda i: (0, 0)),        # pooled features (f32)
            pl.BlockSpec((tile_n, 1), lambda i: (i, 0)),   # raw scores column
            pl.BlockSpec((1, 1), lambda i: (0, 0)),        # softmax running max
            pl.BlockSpec((1, 1), lambda i: (0, 0)),        # softmax denom
        ],
        out_shape=[
            jax.ShapeDtypeStruct((1, l), jnp.float32),
            jax.ShapeDtypeStruct((n, 1), jnp.float32),
            jax.ShapeDtypeStruct((1, 1), jnp.float32),
            jax.ShapeDtypeStruct((1, 1), jnp.float32),
        ],
        scratch_shapes=[
            pltpu.VMEM((1, 1), jnp.float32),   # running max m
            pltpu.VMEM((1, 1), jnp.float32),   # running denom l
            pltpu.VMEM((1, l), jnp.float32),   # weighted-feature accumulator
        ],
        compiler_params=pltpu.CompilerParams(
            dimension_semantics=("arbitrary",),
            vmem_limit_bytes=48 * 1024 * 1024),
    )(x, w_fused, wc)

    scores = jnp.transpose(scores_col)          # [1, N] == A_ori
    attn = jnp.exp(scores - m_fin) / l_fin      # exact softmax(A_ori), [1, N]
    return out, scores, attn


def attention_forward(x, w1, wc, *, act="relu", no_norm=False, tile_n=2048,
                      compute_dtype=jnp.bfloat16):
    """Attention.forward.  x: [N, L]; w1: [D, L], wc: [1, D] (torch layout)."""
    out, scores, attn = _attention_pallas(
        x, jnp.transpose(w1), wc, gated=False, act=act, tile_n=tile_n,
        compute_dtype=compute_dtype)
    return out, (scores if no_norm else attn)


def attention_gated_forward(x, wa, wb, wc, *, act="relu", no_norm=False,
                            tile_n=2048, compute_dtype=jnp.bfloat16):
    """AttentionGated.forward.  wa, wb: [D, L], wc: [1, D] (torch layout)."""
    w_ab = jnp.concatenate([jnp.transpose(wa), jnp.transpose(wb)], axis=1)
    out, scores, attn = _attention_pallas(
        x, w_ab, wc, gated=True, act=act, tile_n=tile_n,
        compute_dtype=compute_dtype)
    return out, (scores if no_norm else attn)


def dattention_forward(x, params, *, gated=False, act="relu",
                       return_attn=False, no_norm=False, tile_n=2048,
                       compute_dtype=jnp.bfloat16):
    """DAttention.forward for a single bag.

    x: [N, L] or [1, N, L].  With K == 1, torch's x.squeeze(1)/attn.squeeze(1)
    on a batch-1 bag give [1, L] / [1, N], which is exactly what is returned.
    """
    if x.ndim == 3:
        assert x.shape[0] == 1, "kernel processes one MIL bag at a time"
        x = x[0]
    if gated:
        out, attn = attention_gated_forward(
            x, params["wa"], params["wb"], params["wc"],
            act=act, no_norm=no_norm, tile_n=tile_n, compute_dtype=compute_dtype)
    else:
        out, attn = attention_forward(
            x, params["w1"], params["wc"],
            act=act, no_norm=no_norm, tile_n=tile_n, compute_dtype=compute_dtype)
    return (out, attn) if return_attn else out


def _reference(x, params, *, gated, act, no_norm):
    act_fn = _ACTS[act]
    if gated:
        a = act_fn(x @ params["wa"].T)
        b = jax.nn.sigmoid(x @ params["wb"].T)
        s = (a * b) @ params["wc"].T
    else:
        s = act_fn(x @ params["w1"].T) @ params["wc"].T
    A_ori = s.T                                  # [1, N]
    A = jax.nn.softmax(A_ori, axis=-1)
    out = A @ x                                  # [1, L]
    return (out, A_ori) if no_norm else (out, A)


if __name__ == "__main__":
    # Module defaults: input_dim L=512; Attention D=256, AttentionGated D=128.
    N, L, K = 300, 512, 1          # N not a multiple of any tile -> ragged path
    key = jax.random.PRNGKey(0)
    kx, k1, kc0, ka, kb, kc1 = jax.random.split(key, 6)
    x = jax.random.normal(kx, (N, L), dtype=jnp.float32)

    def uinit(k, shape, fan_in):
        b = 1.0 / fan_in ** 0.5    # PyTorch Linear default init
        return jax.random.uniform(k, shape, jnp.float32, -b, b)

    # --- DAttention(gated=False): plain Attention, D=256, f32 streaming -----
    # tile_n=128 -> 3 grid steps, ragged last tile.
    D0 = 256
    p0 = {"w1": uinit(k1, (D0, L), L), "wc": uinit(kc0, (K, D0), D0)}
    out0, A0 = dattention_forward(x, p0, gated=False, return_attn=True,
                                  tile_n=128, compute_dtype=None)
    jax.block_until_ready((out0, A0))
    r_out0, r_A0 = _reference(x, p0, gated=False, act="relu", no_norm=False)
    assert out0.shape == (K, L) and A0.shape == (K, N)
    assert jnp.allclose(out0, r_out0, atol=1e-3, rtol=1e-3)
    assert jnp.allclose(A0, r_A0, atol=1e-3, rtol=1e-3)

    # --- DAttention(gated=True): AttentionGated, D=128, f32 streaming -------
    D1 = 128
    p1 = {"wa": uinit(ka, (D1, L), L), "wb": uinit(kb, (D1, L), L),
          "wc": uinit(kc1, (K, D1), D1)}
    out1, A1 = dattention_forward(x, p1, gated=True, return_attn=True,
                                  tile_n=128, compute_dtype=None)
    jax.block_until_ready((out1, A1))
    r_out1, r_A1 = _reference(x, p1, gated=True, act="relu", no_norm=False)
    assert out1.shape == (K, L) and A1.shape == (K, N)
    assert jnp.allclose(out1, r_out1, atol=1e-3, rtol=1e-3)
    assert jnp.allclose(A1, r_A1, atol=1e-3, rtol=1e-3)

    # --- no_norm=True returns the raw (pre-softmax) attention ---------------
    out2, A2 = dattention_forward(x, p1, gated=True, return_attn=True,
                                  no_norm=True, tile_n=128, compute_dtype=None)
    jax.block_until_ready((out2, A2))
    r_out2, r_A2 = _reference(x, p1, gated=True, act="relu", no_norm=True)
    assert jnp.allclose(out2, r_out2, atol=1e-3, rtol=1e-3)
    assert jnp.allclose(A2, r_A2, atol=1e-3, rtol=1e-3)

    # --- default bf16 streaming path, single ragged tile (tile_n > N) -------
    # Exercises the uninitialized-tail masking with a truly uninitialized block.
    out3, A3 = dattention_forward(x, p1, gated=True, return_attn=True,
                                  tile_n=512)
    jax.block_until_ready((out3, A3))
    assert out3.shape == (K, L) and A3.shape == (K, N)
    assert jnp.all(jnp.isfinite(out3)) and jnp.all(jnp.isfinite(A3))
    assert jnp.allclose(out3, r_out1, atol=3e-2, rtol=3e-2)
    assert jnp.allclose(A3, r_A1, atol=3e-2, rtol=3e-2)

    print("KERNEL_OK")
</pallas_src>

<mosaic_0001>
module attributes {stable_mosaic.version = 11 : i64} {
  func.func @kernel(%arg0: i32, %arg1: memref<128x512xf32, #tpu.memory_space<vmem>>, %arg2: memref<512x256xf32, #tpu.memory_space<vmem>>, %arg3: memref<1x256xf32, #tpu.memory_space<vmem>>, %arg4: memref<1x512xf32, #tpu.memory_space<vmem>>, %arg5: memref<128x1xf32, #tpu.memory_space<vmem>>, %arg6: memref<1x1xf32, #tpu.memory_space<vmem>>, %arg7: memref<1x1xf32, #tpu.memory_space<vmem>>, %arg8: memref<1x1xf32, #tpu.memory_space<vmem>>, %arg9: memref<1x1xf32, #tpu.memory_space<vmem>>, %arg10: memref<1x512xf32, #tpu.memory_space<vmem>>) attributes {dimension_semantics = [#tpu.dimension_semantics<arbitrary>], iteration_bounds = array<i64: 3>, scalar_prefetch = 0 : i64, scratch_operands = 3 : i64, tpu.core_type = #tpu.core_type<tc>, window_params = [{transform_indices = @transform_0, window_bounds = array<i64: 128, 512>}, {pipeline_mode = #tpu.pipeline_mode<synchronous>, transform_indices = @transform_1, window_bounds = array<i64: 512, 256>}, {pipeline_mode = #tpu.pipeline_mode<synchronous>, transform_indices = @transform_2, window_bounds = array<i64: 1, 256>}, {pipeline_mode = #tpu.pipeline_mode<synchronous>, transform_indices = @transform_3, window_bounds = array<i64: 1, 512>}, {transform_indices = @transform_4, window_bounds = array<i64: 128, 1>}, {pipeline_mode = #tpu.pipeline_mode<synchronous>, transform_indices = @transform_5, window_bounds = array<i64: 1, 1>}, {pipeline_mode = #tpu.pipeline_mode<synchronous>, transform_indices = @transform_6, window_bounds = array<i64: 1, 1>}]} {
    %c0_i32 = arith.constant 0 : i32
    %0 = arith.cmpi eq, %arg0, %c0_i32 : i32
    %1 = arith.extui %0 : i1 to i32
    %c0_i32_0 = arith.constant 0 : i32
    %2 = arith.cmpi ne, %1, %c0_i32_0 : i32
    scf.if %2 {
      %cst_28 = arith.constant -1.000000e+30 : f32
      %60 = vector.broadcast %cst_28 : f32 to vector<1x1xf32>
      %c0_29 = arith.constant 0 : index
      %c0_30 = arith.constant 0 : index
      %61 = vector.load %arg8[%c0_29, %c0_30] : memref<1x1xf32, #tpu.memory_space<vmem>>, vector<1x1xf32>
      tpu.vector_store %arg8[%c0_29, %c0_30], %60 {strides = array<i32>} : memref<1x1xf32, #tpu.memory_space<vmem>>, vector<1x1xf32>,
      %cst_31 = arith.constant 0.000000e+00 : f32
      %62 = vector.broadcast %cst_31 : f32 to vector<1x1xf32>
      %c0_32 = arith.constant 0 : index
      %c0_33 = arith.constant 0 : index
      %63 = vector.load %arg9[%c0_32, %c0_33] : memref<1x1xf32, #tpu.memory_space<vmem>>, vector<1x1xf32>
      tpu.vector_store %arg9[%c0_32, %c0_33], %62 {strides = array<i32>} : memref<1x1xf32, #tpu.memory_space<vmem>>, vector<1x1xf32>,
      %cst_34 = arith.constant 0.000000e+00 : f32
      %64 = vector.broadcast %cst_34 : f32 to vector<1x512xf32>
      %c0_35 = arith.constant 0 : index
      %c0_36 = arith.constant 0 : index
      %65 = vector.load %arg10[%c0_35, %c0_36] : memref<1x512xf32, #tpu.memory_space<vmem>>, vector<1x512xf32>
      tpu.vector_store %arg10[%c0_35, %c0_36], %64 {strides = array<i32>} : memref<1x512xf32, #tpu.memory_space<vmem>>, vector<1x512xf32>,
    } else {
    }
    %c0 = arith.constant 0 : index
    %c0_1 = arith.constant 0 : index
    %3 = vector.load %arg1[%c0, %c0_1] : memref<128x512xf32, #tpu.memory_space<vmem>>, vector<128x512xf32>
    %c0_2 = arith.constant 0 : index
    %c0_3 = arith.constant 0 : index
    %4 = vector.load %arg2[%c0_2, %c0_3] : memref<512x256xf32, #tpu.memory_space<vmem>>, vector<512x256xf32>
    %cst = arith.constant dense<0.000000e+00> : vector<128x256xf32>
    %5 = tpu.matmul %3, %4, %cst {dimension_numbers = #tpu.dot_dimension_numbers<[1], [0], [0], [1], [0, 0, 1, 1], [], []>} : vector<128x512xf32>, vector<512x256xf32>, vector<128x256xf32> -> vector<128x256xf32>
    %cst_4 = arith.constant 0.000000e+00 : f32
    %6 = vector.broadcast %cst_4 : f32 to vector<128x256xf32>
    %7 = arith.maximumf %5, %6 : vector<128x256xf32>
    %c0_5 = arith.constant 0 : index
    %c0_6 = arith.constant 0 : index
    %8 = vector.load %arg3[%c0_5, %c0_6] : memref<1x256xf32, #tpu.memory_space<vmem>>, vector<1x256xf32>
    %9 = vector.broadcast %8 : vector<1x256xf32> to vector<128x256xf32>
    %10 = arith.mulf %7, %9 : vector<128x256xf32>
    %cst_7 = arith.constant dense<0.000000e+00> : vector<128xf32>
    %11 = vector.multi_reduction <add>, %10, %cst_7 [1] : vector<128x256xf32> to vector<128xf32>
    %12 = vector.shape_cast %11 : vector<128xf32> to vector<128x1xf32>
    %c128_i32 = arith.constant 128 : i32
    %13 = arith.muli %arg0, %c128_i32 : i32
    %14 = tpu.iota {dimensions = array<i32: 0>} : vector<128x1xi32>
    %15 = vector.broadcast %13 : i32 to vector<128x1xi32>
    %16 = arith.addi %15, %14 : vector<128x1xi32>
    %c300_i32 = arith.constant 300 : i32
    %17 = vector.broadcast %c300_i32 : i32 to vector<128x1xi32>
    %18 = arith.cmpi slt, %16, %17 : vector<128x1xi32>
    %cst_8 = arith.constant -1.000000e+30 : f32
    %19 = vector.broadcast %cst_8 : f32 to vector<128x1xf32>
    %20 = arith.select %18, %12, %19 : vector<128x1xi1>, vector<128x1xf32>
    %c0_9 = arith.constant 0 : index
    %c0_10 = arith.constant 0 : index
    %21 = vector.load %arg5[%c0_9, %c0_10] : memref<128x1xf32, #tpu.memory_space<vmem>>, vector<128x1xf32>
    tpu.vector_store %arg5[%c0_9, %c0_10], %20 {strides = array<i32>} : memref<128x1xf32, #tpu.memory_space<vmem>>, vector<128x1xf32>,
    %c0_11 = arith.constant 0 : index
    %c0_12 = arith.constant 0 : index
    %22 = vector.load %arg8[%c0_11, %c0_12] : memref<1x1xf32, #tpu.memory_space<vmem>>, vector<1x1xf32>
    %23 = vector.shape_cast %20 : vector<128x1xf32> to vector<1x128x1xf32>
    %cst_13 = arith.constant dense<0xFF800000> : vector<1xf32>
    %24 = vector.multi_reduction <maximumf>, %23, %cst_13 [1, 2] : vector<1x128x1xf32> to vector<1xf32>
    %25 = vector.shape_cast %24 : vector<1xf32> to vector<1x1x1xf32>
    %26 = vector.extract %25[0, 0, 0] : f32 from vector<1x1x1xf32>
    %27 = vector.broadcast %26 : f32 to vector<1x1xf32>
    %28 = arith.maximumf %22, %27 : vector<1x1xf32>
    %29 = arith.subf %22, %28 : vector<1x1xf32>
    %30 = math.exp %29 : vector<1x1xf32>
    %31 = vector.broadcast %28 : vector<1x1xf32> to vector<128x1xf32>
    %32 = arith.subf %20, %31 : vector<128x1xf32>
    %33 = math.exp %32 : vector<128x1xf32>
    %c0_14 = arith.constant 0 : index
    %c0_15 = arith.constant 0 : index
    %34 = vector.load %arg9[%c0_14, %c0_15] : memref<1x1xf32, #tpu.memory_space<vmem>>, vector<1x1xf32>
    %35 = arith.mulf %30, %34 : vector<1x1xf32>
    %36 = vector.shape_cast %33 : vector<128x1xf32> to vector<1x128x1xf32>
    %cst_16 = arith.constant dense<0.000000e+00> : vector<1xf32>
    %37 = vector.multi_reduction <add>, %36, %cst_16 [1, 2] : vector<1x128x1xf32> to vector<1xf32>
    %38 = vector.shape_cast %37 : vector<1xf32> to vector<1x1x1xf32>
    %39 = vector.extract %38[0, 0, 0] : f32 from vector<1x1x1xf32>
    %40 = vector.broadcast %39 : f32 to vector<1x1xf32>
    %41 = arith.addf %35, %40 : vector<1x1xf32>
    %c0_17 = arith.constant 0 : index
    %c0_18 = arith.constant 0 : index
    %42 = vector.load %arg9[%c0_17, %c0_18] : memref<1x1xf32, #tpu.memory_space<vmem>>, vector<1x1xf32>
    tpu.vector_store %arg9[%c0_17, %c0_18], %41 {strides = array<i32>} : memref<1x1xf32, #tpu.memory_space<vmem>>, vector<1x1xf32>,
    %43 = vector.broadcast %33 : vector<128x1xf32> to vector<128x512xf32>
    %44 = arith.mulf %43, %3 : vector<128x512xf32>
    %cst_19 = arith.constant 0.000000e+00 : f32
    %45 = vector.shape_cast %18 : vector<128x1xi1> to vector<128x1xi1>
    %46 = vector.broadcast %45 : vector<128x1xi1> to vector<128x512xi1>
    %47 = vector.broadcast %cst_19 : f32 to vector<128x512xf32>
    %48 = arith.select %46, %44, %47 : vector<128x512xi1>, vector<128x512xf32>
    %c0_20 = arith.constant 0 : index
    %c0_21 = arith.constant 0 : index
    %49 = vector.load %arg10[%c0_20, %c0_21] : memref<1x512xf32, #tpu.memory_space<vmem>>, vector<1x512xf32>
    %50 = vector.broadcast %30 : vector<1x1xf32> to vector<1x512xf32>
    %51 = arith.mulf %50, %49 : vector<1x512xf32>
    %cst_22 = arith.constant dense<0.000000e+00> : vector<512xf32>
    %52 = vector.multi_reduction <add>, %48, %cst_22 [0] : vector<128x512xf32> to vector<512xf32>
    %53 = vector.shape_cast %52 : vector<512xf32> to vector<1x512xf32>
    %54 = arith.addf %51, %53 : vector<1x512xf32>
    %c0_23 = arith.constant 0 : index
    %c0_24 = arith.constant 0 : index
    %55 = vector.load %arg10[%c0_23, %c0_24] : memref<1x512xf32, #tpu.memory_space<vmem>>, vector<1x512xf32>
    tpu.vector_store %arg10[%c0_23, %c0_24], %54 {strides = array<i32>} : memref<1x512xf32, #tpu.memory_space<vmem>>, vector<1x512xf32>,
    %c0_25 = arith.constant 0 : index
    %c0_26 = arith.constant 0 : index
    %56 = vector.load %arg8[%c0_25, %c0_26] : memref<1x1xf32, #tpu.memory_space<vmem>>, vector<1x1xf32>
    tpu.vector_store %arg8[%c0_25, %c0_26], %28 {strides = array<i32>} : memref<1x1xf32, #tpu.memory_space<vmem>>, vector<1x1xf32>,
    %c2_i32 = arith.constant 2 : i32
    %57 = arith.cmpi eq, %arg0, %c2_i32 : i32
    %58 = arith.extui %57 : i1 to i32
    %c0_i32_27 = arith.constant 0 : i32
    %59 = arith.cmpi ne, %58, %c0_i32_27 : i32
    scf.if %59 {
      %c0_28 = arith.constant 0 : index
      %c0_29 = arith.constant 0 : index
      %60 = vector.load %arg10[%c0_28, %c0_29] : memref<1x512xf32, #tpu.memory_space<vmem>>, vector<1x512xf32>
      %c0_30 = arith.constant 0 : index
      %c0_31 = arith.constant 0 : index
      %61 = vector.load %arg9[%c0_30, %c0_31] : memref<1x1xf32, #tpu.memory_space<vmem>>, vector<1x1xf32>
      %62 = vector.broadcast %61 : vector<1x1xf32> to vector<1x512xf32>
      %63 = arith.divf %60, %62 : vector<1x512xf32>
      %c0_32 = arith.constant 0 : index
      %c0_33 = arith.constant 0 : index
      %64 = vector.load %arg4[%c0_32, %c0_33] : memref<1x512xf32, #tpu.memory_space<vmem>>, vector<1x512xf32>
      tpu.vector_store %arg4[%c0_32, %c0_33], %63 {strides = array<i32>} : memref<1x512xf32, #tpu.memory_space<vmem>>, vector<1x512xf32>,
      %c0_34 = arith.constant 0 : index
      %c0_35 = arith.constant 0 : index
      %65 = vector.load %arg8[%c0_34, %c0_35] : memref<1x1xf32, #tpu.memory_space<vmem>>, vector<1x1xf32>
      %c0_36 = arith.constant 0 : index
      %c0_37 = arith.constant 0 : index
      %66 = vector.load %arg6[%c0_36, %c0_37] : memref<1x1xf32, #tpu.memory_space<vmem>>, vector<1x1xf32>
      tpu.vector_store %arg6[%c0_36, %c0_37], %65 {strides = array<i32>} : memref<1x1xf32, #tpu.memory_space<vmem>>, vector<1x1xf32>,
      %c0_38 = arith.constant 0 : index
      %c0_39 = arith.constant 0 : index
      %67 = vector.load %arg9[%c0_38, %c0_39] : memref<1x1xf32, #tpu.memory_space<vmem>>, vector<1x1xf32>
      %c0_40 = arith.constant 0 : index
      %c0_41 = arith.constant 0 : index
      %68 = vector.load %arg7[%c0_40, %c0_41] : memref<1x1xf32, #tpu.memory_space<vmem>>, vector<1x1xf32>
      tpu.vector_store %arg7[%c0_40, %c0_41], %67 {strides = array<i32>} : memref<1x1xf32, #tpu.memory_space<vmem>>, vector<1x1xf32>,
    } else {
    }
    return
  }
  func.func @transform_0(%arg0: i32) -> (i32, i32) {
    %c0_i32 = arith.constant 0 : i32
    %c0_i32_0 = arith.constant 0 : i32
    return %arg0, %c0_i32 : i32, i32
  }
  func.func @transform_1(%arg0: i32) -> (i32, i32) {
    %c0_i32 = arith.constant 0 : i32
    %c0_i32_0 = arith.constant 0 : i32
    %c0_i32_1 = arith.constant 0 : i32
    return %c0_i32, %c0_i32_0 : i32, i32
  }
  func.func @transform_2(%arg0: i32) -> (i32, i32) {
    %c0_i32 = arith.constant 0 : i32
    %c0_i32_0 = arith.constant 0 : i32
    %c0_i32_1 = arith.constant 0 : i32
    return %c0_i32, %c0_i32_0 : i32, i32
  }
  func.func @transform_3(%arg0: i32) -> (i32, i32) {
    %c0_i32 = arith.constant 0 : i32
    %c0_i32_0 = arith.constant 0 : i32
    %c0_i32_1 = arith.constant 0 : i32
    return %c0_i32, %c0_i32_0 : i32, i32
  }
  func.func @transform_4(%arg0: i32) -> (i32, i32) {
    %c0_i32 = arith.constant 0 : i32
    %c0_i32_0 = arith.constant 0 : i32
    return %arg0, %c0_i32 : i32, i32
  }
  func.func @transform_5(%arg0: i32) -> (i32, i32) {
    %c0_i32 = arith.constant 0 : i32
    %c0_i32_0 = arith.constant 0 : i32
    %c0_i32_1 = arith.constant 0 : i32
    return %c0_i32, %c0_i32_0 : i32, i32
  }
  func.func @transform_6(%arg0: i32) -> (i32, i32) {
    %c0_i32 = arith.constant 0 : i32
    %c0_i32_0 = arith.constant 0 : i32
    %c0_i32_1 = arith.constant 0 : i32
    return %c0_i32, %c0_i32_0 : i32, i32
  }
}

</mosaic_0001>

<bundles_post_ra>
// kernel: tpu_custom_call.1
= control target key start
LH: loop header
LB: loop body
LE: loop exit
PB: predicated region body
PF: predicated region fallthrough
CT: control target
= control target key end

     0   :  { %12 = vsyncpa [#allocation6], 0  ;;  %s3716_s0 = inlined_call_operand.hbm [shape: f32[300,512], index: 0, kind: input, shape index: {}]   ;;  %s3717_s1 = inlined_call_operand.hbm [shape: f32[512,256], index: 1, kind: input, shape index: {}]   ;;  %s3718_s2 = inlined_call_operand.vmem [shape: f32[1,256], index: 2, kind: input, shape index: {}]   ;;  %s3719_s3 = inlined_call_operand.hbm [shape: f32[1,512], index: 3, kind: output, shape index: {0}]   ;;  %s3720_s4 = inlined_call_operand.vmem [shape: f32[300,1], index: 4, kind: output, shape index: {1}]   ;;  %s3721_s5 = inlined_call_operand.hbm [shape: f32[1,1], index: 5, kind: output, shape index: {2}]   ;;  %s3722_s6 = inlined_call_operand.hbm [shape: f32[1,1], index: 6, kind: output, shape index: {3}]  }
   0x1   :  { %14 = vsyncpa [#allocation6 + $0x1], 0 }
   0x2   :  { %15 = vsyncpa [#allocation9], 0 }
   0x3   :  { %16 = vsyncpa [#allocation7], 0 }
   0x4   :  { %17 = vsyncpa [#allocation13], 0  ;;  %s2661_s21 = smov 0   ;;  %s2663_s22 = smov 0  }
   0x5   :  { %s2665_s23 = smov 0   ;;  %s2667_s24 = smov 0  }
   0x6 LB: > { %s2680_s25 = sadd.s32 4294967295, %s2578_s24   ;;  %s2683_s26 = sadd.s32 1, %s2578_s24   ;;  %s2578_s24 = sphi %s2667_s24, %s3778_s24   ;;  %s2574_s23 = sphi %s2665_s23, %s3777_s23   ;;  %s2570_s22 = sphi %s2663_s22, %s3776_s22   ;;  %s2566_s21 = sphi %s2661_s21, %s3775_s21  }
   0x7   : > { %s27_s27 = ssub.s32 %s2578_s24, %s2683_s26  ;;  %s30_s28 = sadd.s32 1, %s2574_s23 }
   0x8   : > { %p28_p0 = scmp.eq.s32.totalorder %s27_s27, 0  ;;  %p37_p1 = scmp.ne.s32.totalorder %s2574_s23, %s2570_s22 }
   0x9   : > { %p38_p2 = scmp.eq.s32.totalorder %s2578_s24, 0  ;;  %p43_p3 = scmp.ne.s32.totalorder %s2570_s22, %s2566_s21 }
   0xa   : > { %s2693_s29 = scalar_select %p28_p0, %s2574_s23, %s30_s28  }
   0xb   : > { %p2695_p4 = por %p38_p2, %p37_p1  ;;  %p3724_p5 = scmp.eq.s32.totalorder %s2680_s25, 0 }
   0xc   : > { %p3723_p6 = scmp.eq.s32.totalorder %s2680_s25, 2  ;;  %p1913_p7 = scmp.ge.s32.totalorder %s2578_s24, 1 }
   0xd   : > { %s3732_s30 = scalar_select %p2695_p4, 1, 0 }
   0xe   : > { %p2704_p8 = por %p3724_p5, %p43_p3  ;;  %p185_p9 = scmp.lt.s32.totalorder %s2578_s24, 4 }
   0xf   : > { %p2711_p10 = por %p3723_p6, %p37_p1  ;;  %s2612_s10 = smov [#allocation8]  }
  0x10   : > { %s3733_s7 = scalar_select %p2704_p8, 1, 0 }
  0x11   : > { %s3734_s8 = scalar_select %p2711_p10, 1, 0 }
  0x12   : > { %p2716_p12 = pnand %p1913_p7, %p185_p9  ;;  %s197_s11 = sshll.u32 %s2612_s10, 4  ;;  %s198_s11 = int_to_ptr.vmem [resolvable:$true] %s197_s11 }
  0x13   : > { %s2366_s15 = scalar_lea.hbm %s3717_s1, 16384 }
  0x14   : > { %s3735_s9 = scalar_select %p2716_p12, 1, 0 }
  0x15   : > { %p2142_p13 = pneg %p2716_p12  ;;  %p2367_p1 = scmp.ne.s32.totalorder %s3717_s1, %s2366_s15 }
  0x16   : > { %p2373_p9 = scmp.lt.u32.totalorder %s2366_s15, %s3717_s1 }
  0x17   : > { %p2724_p0 = pnand %p2142_p13, %p3724_p5 }
  0x19   : > { %p2368_p2 = pneg %p2724_p0 }
  0x1b   : > { %p2369_p3 = pnand %p2368_p2, %p2367_p1 }
  0x1d   : > { %p2370_p7 = pneg %p2369_p3 }
  0x1f   : > { %p2375_p13 = pnand %p2373_p9, %p2370_p7 }
  0x21   : > { %2378 = shalt.err (!%p2375_p13)
}
  0x22   : > { %s2379_s20 = scalar_lea.vmem %s198_s11, 16384  ;;  %p2387_p10 = scmp.lt.s32.totalorder %s198_s11, %s198_s11 }
  0x23   : > { %p2380_p6 = scmp.ne.s32.totalorder %s198_s11, %s2379_s20  ;;  %p2388_p8 = scmp.lt.s32.totalorder %s2379_s20, %s2379_s20 }
  0x25   : > { %p2382_p11 = pnand %p2380_p6, %p2368_p2  ;;  %p2389_p12 = por %p2388_p8, %p2387_p10 }
  0x27   : > { %p2383_p5 = pneg %p2382_p11 }
  0x29   : > { %p2390_p4 = pnand %p2389_p12, %p2383_p5 }
  0x2b   : > { %2393 = shalt.err (!%p2390_p4)
}
  0x2c   : > { %s2613_s21 = smov 256   ;;  %s2614_s27 = smov 16  }
  0x2d   : > { %2145 = dma.hbm_to_vmem [thread:$0]  (!%p2724_p0), %s3717_s1, 16384, %s198_s11, [#allocation9], %s2613_s21, %s2613_s21, %s2614_s27  }
  0x2e   : > { %p1915_p1 = scmp.ge.s32.totalorder %s2578_s24, 3 }
  0x2f   : > { %p3737_p3 = scmp.ne.s32.totalorder (!%p1915_p1), %s3732_s30, 0 }
  0x30   : > { %210 = sbr.rel (%p1915_p1) target bundleno = 90 (0x5a), region = 24 }
  0x37   : > { %213 = sbr.rel (!%p3737_p3) target bundleno = 90 (0x5a), region = 28  ;;  %s214_s13 = sand.u32 (%p3737_p3), 1, %s2574_s23  }
  0x38   : > { %s1917_s14 = sshll.u32 (%p3737_p3), %s2578_s24, 4  ;;  %s1916_s15 = sshll.u32 (%p3737_p3), %s214_s13, 9 }
  0x39   : > { %s220_s16 = ssub.s32 (%p3737_p3), 38, %s1917_s14  ;;  %s2752_s18 = scalar_lea.sflag (%p3737_p3), [#allocation6], %s214_s13 }
  0x3a   : > { %p221_p4 = scmp.lt.s32.totalorder (%p3737_p3), %s220_s16, 16  ;;  %s218_s11 = scalar_lea.vmem (%p3737_p3), [#allocation5], %s1916_s15 }
  0x3e   : > { %s3780_s16 = smov (!%p221_p4, %s220_s16), 16 }
  0x3f   : > { %s2749_s17 = sshll.u32 %s3780_s16, 9 }
  0x40   : > { %s226_s12 = ssub.s32 8192, %s2749_s17 }
  0x41   : > { %227 = vsyncadd %s2752_s18, %s226_s12  ;;  %p1920_p5 = scmp.ne.s32.totalorder %s2749_s17, 0  ;;  %s1957_s30 = sshll.u32 %s2578_s24, 13 }
  0x42   : > { %s2760_s21 = scalar_lea.hbm %s3716_s0, %s1957_s30  ;;  %s233_s27 = sshll.u32 %s218_s11, 4  ;;  %s2762_s27 = int_to_ptr.vmem [resolvable:$true] %s233_s27 }
  0x43   : > { %s2394_s28 = scalar_lea.hbm %s2760_s21, %s2749_s17  ;;  %s2398_s24 = scalar_lea.hbm %s3716_s0, 19456 }
  0x44   : > { %p2395_p6 = scmp.ne.s32.totalorder %s2760_s21, %s2394_s28  ;;  %p2399_p11 = scmp.lt.u32.totalorder %s2760_s21, %s3716_s0 }
  0x45   : > { %p2400_p12 = scmp.lt.u32.totalorder %s2398_s24, %s2394_s28  ;;  %p2402_p2 = scmp.lt.u32.totalorder %s2394_s28, %s2760_s21 }
  0x46   : > { %p2396_p8 = pnand %p2395_p6, %p1920_p5 }
  0x47   : > { %p2401_p0 = por %p2400_p12, %p2399_p11 }
  0x48   : > { %p2397_p10 = pneg %p2396_p8 }
  0x49   : > { %p2403_p7 = por %p2402_p2, %p2401_p0 }
  0x4b   : > { %p2404_p9 = pnand %p2403_p7, %p2397_p10 }
  0x4d   : > { %2407 = shalt.err (!%p2404_p9)
}
  0x4e   : > { %s2408_s16 = scalar_lea.vmem %s2762_s27, %s2749_s17  ;;  %s2615_s12 = smov [#allocation5]  }
  0x4f   : > { %p2409_p13 = scmp.ne.s32.totalorder %s2762_s27, %s2408_s16  ;;  %s2412_s11 = sshll.u32 %s2615_s12, 4  ;;  %s2413_s11 = int_to_ptr.vmem [resolvable:$false] %s2412_s11 }
  0x50   : > { %s2414_s30 = scalar_lea.vmem %s2413_s11, 16384  ;;  %p2415_p4 = scmp.lt.s32.totalorder %s2762_s27, %s2413_s11 }
  0x51   : > { %p2410_p1 = pnand %p2409_p13, %p1920_p5  ;;  %p2416_p6 = scmp.lt.s32.totalorder %s2414_s30, %s2408_s16 }
  0x53   : > { %p2411_p3 = pneg %p2410_p1  ;;  %p2417_p8 = por %p2416_p6, %p2415_p4 }
  0x55   : > { %p2418_p11 = pnand %p2417_p8, %p2411_p3 }
  0x57   : > { %2421 = shalt.err (!%p2418_p11)
}
  0x58   : > { %s2616_s19 = smov 512   ;;  %s2617_s20 = smov 32  }
  0x59   : > { %239 = dma.hbm_to_vmem [thread:$0]  (%p1920_p5), %s2760_s21, %s2749_s17, %s2762_s27, %s2752_s18, %s2616_s19, %s2616_s19, %s2617_s20  }
  0x5a PF: > { %p3738_p10 = scmp.ne.s32.totalorder %s3735_s9, 0 }
  0x5c   : > { %245 = sbr.rel (%p3738_p10) target bundleno = 1226 (0x4ca), region = 32 }
  0x63   : > { %s247_s28 = sand.u32 1, %s2570_s22   ;;  %p3739_p12 = scmp.ne.s32.totalorder %s3733_s7, 0 }
  0x64   : > { %s1926_s10 = sshll.u32 %s247_s28, 9  ;;  %s248_s13 = scalar_lea.sflag [#allocation6], %s247_s28 }
  0x65   : > { %s2792_s24 = scalar_lea.vmem [#allocation5], %s1926_s10 }
  0x66   : > { %2549 = dma.done.wait (%p3739_p12), %s248_s13, 8192  }
  0x67   : > { %2551 = vsyncadd (%p3739_p12), %s248_s13, 4294959104  ;;  %p3740_p0 = scmp.eq.s32.totalorder %s2680_s25, 0 }
  0x69   : > { %2553 = dma.done.wait (%p3740_p0), [#allocation9], 16384   ;;  %p3741_p5 = pmov %p3740_p0 }
  0x6a   : > { %s1928_s9 = sshll.u32 %s247_s28, 7  ;;  %p3742_p2 = scmp.ne.s32.totalorder %s2680_s25, 0 }
  0x6b   : > { %2555 = vsyncadd (%p3741_p5), [#allocation9], 4294950912  ;;  %s2802_s17 = scalar_lea.vmem [#allocation11], %s1928_s9   ;;  %vm298_vm0 = vcmask (!%p3742_p2), 0   ;;  %v301_v0 = vlaneseq (!%p3742_p2)  ;;  %v2618_v1 = vmov (!%p3742_p2), -1e+30  }
  0x6c   : > { %297 = sbr.rel (%p3742_p2) target bundleno = 115 (0x73), region = 44  ;;  %299 = vst.msk [vmem:[#allocation2] sm:$0x1] (!%p3742_p2), %vm298_vm0, %v2618_v1  ;;  %v2619_v2 = vmov (!%p3742_p2), 0.0  }
  0x6d   : > { %300 = vst.msk [vmem:[#allocation3] sm:$0x1] (!%p3742_p2), %vm298_vm0, %v2619_v2  ;;  %vm303_vm1 = vcmp.lt.s32.totalorder (!%p3742_p2), %v301_v0, 512 }
  0x6e   : > { %305 = vst.msk [vmem:[#allocation4] sm:$0xf] (!%p3742_p2), %vm303_vm1, %v2619_v2 }
  0x73 PF: > { %v371_v3 = vld [vmem:[#allocation8 + $0x8] sm:$0xff]  ;;  %v373_v4 = vld [vmem:[#allocation8 + $0x18] sm:$0xff]  ;;  %v370_v8 = vld [vmem:[#allocation8] sm:$0xff]  ;;  %s1930_s21 = sshll.u32 %s2680_s25, 7  ;;  %vm1011_vm3 = vcmask 7168   ;;  %p1931_p7 = scmp.ne.s32.totalorder %s2680_s25, 2 }
  0x74   : > { %v435_v5 = vld [vmem:[#allocation8 + $0x208] sm:$0xff]  ;;  %v1961_v6 = vpack.c.bf16 %v373_v4, %v371_v3  ;;  %v437_v7 = vld [vmem:[#allocation8 + $0x218] sm:$0xff]  ;;  %v372_v9 = vld [vmem:[#allocation8 + $0x10] sm:$0xff] }
  0x75   : > { %v2025_v10 = vpack.c.bf16 %v437_v7, %v435_v5  ;;  %v1963_v11 = vpack.c.bf16 %v372_v9, %v370_v8  ;;  %v434_v12 = vld [vmem:[#allocation8 + $0x200] sm:$0xff]  ;;  %v436_v13 = vld [vmem:[#allocation8 + $0x210] sm:$0xff]  ;;  %v375_v14 = vld [vmem:[#allocation8 + $0x28] sm:$0xff] }
  0x76   : > { %1962 = vmatprep.subr.bf16.mxu1 %v1961_v6  ;;  %v2027_v15 = vpack.c.bf16 %v436_v13, %v434_v12  ;;  %v377_v16 = vld [vmem:[#allocation8 + $0x38] sm:$0xff]  ;;  %v439_v17 = vld [vmem:[#allocation8 + $0x228] sm:$0xff]  ;;  %v374_v21 = vld [vmem:[#allocation8 + $0x20] sm:$0xff] }
  0x77   : > { %v441_v18 = vld [vmem:[#allocation8 + $0x238] sm:$0xff]  ;;  %2026 = vmatprep.subr.bf16.mxu0 %v2025_v10  ;;  %1964 = vmatpush1.bf16.msra.mxu1 %v1963_v11  ;;  %v1965_v19 = vpack.c.bf16 %v377_v16, %v375_v14  ;;  %v376_v22 = vld [vmem:[#allocation8 + $0x30] sm:$0xff]  ;;  %v438_v23 = vld [vmem:[#allocation8 + $0x220] sm:$0xff] }
  0x78   : > { %v2029_v20 = vpack.c.bf16 %v441_v18, %v439_v17  ;;  %2028 = vmatpush1.bf16.msra.mxu0 %v2027_v15  ;;  %v1967_v24 = vpack.c.bf16 %v376_v22, %v374_v21  ;;  %v440_v25 = vld [vmem:[#allocation8 + $0x230] sm:$0xff]  ;;  %v379_v26 = vld [vmem:[#allocation8 + $0x48] sm:$0xff]  ;;  %v381_v27 = vld [vmem:[#allocation8 + $0x58] sm:$0xff] }
  0x79   : > { %1966 = vmatprep.subr.bf16.mxu1 %v1965_v19  ;;  %v2031_v28 = vpack.c.bf16 %v440_v25, %v438_v23  ;;  %v1969_v29 = vpack.c.bf16 %v381_v27, %v379_v26  ;;  %v443_v30 = vld [vmem:[#allocation8 + $0x248] sm:$0xff]  ;;  %v445_v31 = vld [vmem:[#allocation8 + $0x258] sm:$0xff]  ;;  %v378_v32 = vld [vmem:[#allocation8 + $0x40] sm:$0xff] }
  0x7a   : > { %2030 = vmatprep.subr.bf16.mxu0 %v2029_v20  ;;  %v2033_v33 = vpack.c.bf16 %v445_v31, %v443_v30  ;;  %v380_v34 = vld [vmem:[#allocation8 + $0x50] sm:$0xff]  ;;  %v442_v35 = vld [vmem:[#allocation8 + $0x240] sm:$0xff]  ;;  %v383_v38 = vld [vmem:[#allocation8 + $0x68] sm:$0xff] }
  0x7b   : > { %v444_v36 = vld [vmem:[#allocation8 + $0x250] sm:$0xff]  ;;  %1968 = vmatpush1.bf16.msra.mxu1 %v1967_v24  ;;  %v1971_v37 = vpack.c.bf16 %v380_v34, %v378_v32  ;;  %v385_v39 = vld [vmem:[#allocation8 + $0x78] sm:$0xff]  ;;  %v447_v40 = vld [vmem:[#allocation8 + $0x268] sm:$0xff] }
  0x7c   : > { %2032 = vmatpush1.bf16.msra.mxu0 %v2031_v28  ;;  %1970 = vmatprep.subr.bf16.mxu1 %v1969_v29  ;;  %v2035_v41 = vpack.c.bf16 %v444_v36, %v442_v35  ;;  %v1973_v42 = vpack.c.bf16 %v385_v39, %v383_v38  ;;  %v449_v43 = vld [vmem:[#allocation8 + $0x278] sm:$0xff]  ;;  %v382_v44 = vld [vmem:[#allocation8 + $0x60] sm:$0xff]  ;;  %v384_v45 = vld [vmem:[#allocation8 + $0x70] sm:$0xff] }
  0x7d   : > { %2034 = vmatprep.subr.bf16.mxu0 %v2033_v33  ;;  %v2037_v46 = vpack.c.bf16 %v449_v43, %v447_v40  ;;  %v446_v47 = vld [vmem:[#allocation8 + $0x260] sm:$0xff]  ;;  %v448_v48 = vld [vmem:[#allocation8 + $0x270] sm:$0xff]  ;;  %v387_v49 = vld [vmem:[#allocation8 + $0x88] sm:$0xff]  ;;  %v1975_v53 = vpack.c.bf16 %v384_v45, %v382_v44 }
  0x7e   : > { %v389_v50 = vld [vmem:[#allocation8 + $0x98] sm:$0xff]  ;;  %v451_v51 = vld [vmem:[#allocation8 + $0x288] sm:$0xff]  ;;  %v2039_v54 = vpack.c.bf16 %v448_v48, %v446_v47  ;;  %v386_v56 = vld [vmem:[#allocation8 + $0x80] sm:$0xff] }
  0x7f   : > { %v453_v52 = vld [vmem:[#allocation8 + $0x298] sm:$0xff]  ;;  %1972 = vmatpush1.bf16.msra.mxu1 %v1971_v37  ;;  %v1977_v55 = vpack.c.bf16 %v389_v50, %v387_v49  ;;  %v388_v57 = vld [vmem:[#allocation8 + $0x90] sm:$0xff]  ;;  %v450_v58 = vld [vmem:[#allocation8 + $0x280] sm:$0xff] }
  0x80   : > { %2036 = vmatpush1.bf16.msra.mxu0 %v2035_v41  ;;  %1974 = vmatprep.subr.bf16.mxu1 %v1973_v42  ;;  %v2041_v59 = vpack.c.bf16 %v453_v52, %v451_v51  ;;  %v452_v60 = vld [vmem:[#allocation8 + $0x290] sm:$0xff]  ;;  %v391_v61 = vld [vmem:[#allocation8 + $0xa8] sm:$0xff]  ;;  %v393_v62 = vld [vmem:[#allocation8 + $0xb8] sm:$0xff]  ;;  %v1979_v1 = vpack.c.bf16 %v388_v57, %v386_v56 }
  0x81   : > { %2038 = vmatprep.subr.bf16.mxu0 %v2037_v46  ;;  %v455_v63 = vld [vmem:[#allocation8 + $0x2a8] sm:$0xff]  ;;  %v457_v0 = vld [vmem:[#allocation8 + $0x2b8] sm:$0xff]  ;;  %v2043_v2 = vpack.c.bf16 %v452_v60, %v450_v58  ;;  %v1981_v3 = vpack.c.bf16 %v393_v62, %v391_v61  ;;  %v390_v4 = vld [vmem:[#allocation8 + $0xa0] sm:$0xff] }
  0x82   : > { %v392_v5 = vld [vmem:[#allocation8 + $0xb0] sm:$0xff]  ;;  %v454_v6 = vld [vmem:[#allocation8 + $0x2a0] sm:$0xff]  ;;  %v2045_v7 = vpack.c.bf16 %v457_v0, %v455_v63  ;;  %v395_v9 = vld [vmem:[#allocation8 + $0xc8] sm:$0xff] }
  0x83   : > { %1976 = vmatpush1.bf16.msra.mxu1 %v1975_v53  ;;  %v456_v8 = vld [vmem:[#allocation8 + $0x2b0] sm:$0xff]  ;;  %v397_v10 = vld [vmem:[#allocation8 + $0xd8] sm:$0xff]  ;;  %v459_v11 = vld [vmem:[#allocation8 + $0x2c8] sm:$0xff]  ;;  %v1983_v13 = vpack.c.bf16 %v392_v5, %v390_v4 }
  0x84   : > { %2040 = vmatpush1.bf16.msra.mxu0 %v2039_v54  ;;  %1978 = vmatprep.subr.bf16.mxu1 %v1977_v55  ;;  %v461_v12 = vld [vmem:[#allocation8 + $0x2d8] sm:$0xff]  ;;  %v2047_v14 = vpack.c.bf16 %v456_v8, %v454_v6  ;;  %v1985_v15 = vpack.c.bf16 %v397_v10, %v395_v9  ;;  %v394_v16 = vld [vmem:[#allocation8 + $0xc0] sm:$0xff]  ;;  %v396_v17 = vld [vmem:[#allocation8 + $0xd0] sm:$0xff] }
  0x85   : > { %2042 = vmatprep.subr.bf16.mxu0 %v2041_v59  ;;  %v458_v18 = vld [vmem:[#allocation8 + $0x2c0] sm:$0xff]  ;;  %v2049_v19 = vpack.c.bf16 %v461_v12, %v459_v11  ;;  %v460_v20 = vld [vmem:[#allocation8 + $0x2d0] sm:$0xff]  ;;  %v399_v21 = vld [vmem:[#allocation8 + $0xe8] sm:$0xff]  ;;  %v1987_v25 = vpack.c.bf16 %v396_v17, %v394_v16 }
  0x86   : > { %v401_v22 = vld [vmem:[#allocation8 + $0xf8] sm:$0xff]  ;;  %v463_v23 = vld [vmem:[#allocation8 + $0x2e8] sm:$0xff]  ;;  %v2051_v26 = vpack.c.bf16 %v460_v20, %v458_v18  ;;  %v398_v28 = vld [vmem:[#allocation8 + $0xe0] sm:$0xff] }
  0x87   : > { %1980 = vmatpush1.bf16.msra.mxu1 %v1979_v1  ;;  %v465_v24 = vld [vmem:[#allocation8 + $0x2f8] sm:$0xff]  ;;  %v1989_v27 = vpack.c.bf16 %v401_v22, %v399_v21  ;;  %v400_v29 = vld [vmem:[#allocation8 + $0xf0] sm:$0xff]  ;;  %v462_v30 = vld [vmem:[#allocation8 + $0x2e0] sm:$0xff] }
  0x88   : > { %2044 = vmatpush1.bf16.msra.mxu0 %v2043_v2  ;;  %1982 = vmatprep.subr.bf16.mxu1 %v1981_v3  ;;  %v2053_v31 = vpack.c.bf16 %v465_v24, %v463_v23  ;;  %v464_v32 = vld [vmem:[#allocation8 + $0x2f0] sm:$0xff]  ;;  %v403_v33 = vld [vmem:[#allocation8 + $0x108] sm:$0xff]  ;;  %v405_v34 = vld [vmem:[#allocation8 + $0x118] sm:$0xff]  ;;  %v1991_v37 = vpack.c.bf16 %v400_v29, %v398_v28 }
  0x89   : > { %2046 = vmatprep.subr.bf16.mxu0 %v2045_v7  ;;  %v467_v35 = vld [vmem:[#allocation8 + $0x308] sm:$0xff]  ;;  %v469_v36 = vld [vmem:[#allocation8 + $0x318] sm:$0xff]  ;;  %v2055_v38 = vpack.c.bf16 %v464_v32, %v462_v30  ;;  %v1993_v39 = vpack.c.bf16 %v405_v34, %v403_v33  ;;  %v402_v40 = vld [vmem:[#allocation8 + $0x100] sm:$0xff] }
  0x8a   : > { %v404_v41 = vld [vmem:[#allocation8 + $0x110] sm:$0xff]  ;;  %v466_v42 = vld [vmem:[#allocation8 + $0x300] sm:$0xff]  ;;  %v2057_v43 = vpack.c.bf16 %v469_v36, %v467_v35  ;;  %v407_v45 = vld [vmem:[#allocation8 + $0x128] sm:$0xff] }
  0x8b   : > { %1984 = vmatpush1.bf16.msra.mxu1 %v1983_v13  ;;  %v468_v44 = vld [vmem:[#allocation8 + $0x310] sm:$0xff]  ;;  %v409_v46 = vld [vmem:[#allocation8 + $0x138] sm:$0xff]  ;;  %v471_v47 = vld [vmem:[#allocation8 + $0x328] sm:$0xff]  ;;  %v1995_v49 = vpack.c.bf16 %v404_v41, %v402_v40 }
  0x8c   : > { %2048 = vmatpush1.bf16.msra.mxu0 %v2047_v14  ;;  %1986 = vmatprep.subr.bf16.mxu1 %v1985_v15  ;;  %v473_v48 = vld [vmem:[#allocation8 + $0x338] sm:$0xff]  ;;  %v2059_v50 = vpack.c.bf16 %v468_v44, %v466_v42  ;;  %v1997_v51 = vpack.c.bf16 %v409_v46, %v407_v45  ;;  %v406_v52 = vld [vmem:[#allocation8 + $0x120] sm:$0xff]  ;;  %v408_v53 = vld [vmem:[#allocation8 + $0x130] sm:$0xff] }
  0x8d   : > { %2050 = vmatprep.subr.bf16.mxu0 %v2049_v19  ;;  %v470_v54 = vld [vmem:[#allocation8 + $0x320] sm:$0xff]  ;;  %v2061_v55 = vpack.c.bf16 %v473_v48, %v471_v47  ;;  %v472_v56 = vld [vmem:[#allocation8 + $0x330] sm:$0xff]  ;;  %v411_v57 = vld [vmem:[#allocation8 + $0x148] sm:$0xff]  ;;  %v1999_v61 = vpack.c.bf16 %v408_v53, %v406_v52 }
  0x8e   : > { %v413_v58 = vld [vmem:[#allocation8 + $0x158] sm:$0xff]  ;;  %v475_v59 = vld [vmem:[#allocation8 + $0x348] sm:$0xff]  ;;  %v2063_v62 = vpack.c.bf16 %v472_v56, %v470_v54  ;;  %v410_v0 = vld [vmem:[#allocation8 + $0x140] sm:$0xff] }
  0x8f   : > { %1988 = vmatpush1.bf16.msra.mxu1 %v1987_v25  ;;  %v477_v60 = vld [vmem:[#allocation8 + $0x358] sm:$0xff]  ;;  %v2001_v63 = vpack.c.bf16 %v413_v58, %v411_v57  ;;  %v412_v1 = vld [vmem:[#allocation8 + $0x150] sm:$0xff]  ;;  %v474_v2 = vld [vmem:[#allocation8 + $0x340] sm:$0xff] }
  0x90   : > { %2052 = vmatpush1.bf16.msra.mxu0 %v2051_v26  ;;  %1990 = vmatprep.subr.bf16.mxu1 %v1989_v27  ;;  %v2065_v3 = vpack.c.bf16 %v477_v60, %v475_v59  ;;  %v476_v4 = vld [vmem:[#allocation8 + $0x350] sm:$0xff]  ;;  %v415_v5 = vld [vmem:[#allocation8 + $0x168] sm:$0xff]  ;;  %v417_v6 = vld [vmem:[#allocation8 + $0x178] sm:$0xff]  ;;  %v2003_v9 = vpack.c.bf16 %v412_v1, %v410_v0 }
  0x91   : > { %2054 = vmatprep.subr.bf16.mxu0 %v2053_v31  ;;  %v479_v7 = vld [vmem:[#allocation8 + $0x368] sm:$0xff]  ;;  %v481_v8 = vld [vmem:[#allocation8 + $0x378] sm:$0xff]  ;;  %v414_v10 = vld [vmem:[#allocation8 + $0x160] sm:$0xff]  ;;  %v2067_v11 = vpack.c.bf16 %v476_v4, %v474_v2  ;;  %v2005_v12 = vpack.c.bf16 %v417_v6, %v415_v5 }
  0x92   : > { %v416_v13 = vld [vmem:[#allocation8 + $0x170] sm:$0xff]  ;;  %v478_v14 = vld [vmem:[#allocation8 + $0x360] sm:$0xff]  ;;  %v2069_v16 = vpack.c.bf16 %v481_v8, %v479_v7  ;;  %v419_v17 = vld [vmem:[#allocation8 + $0x188] sm:$0xff] }
  0x93   : > { %1992 = vmatpush1.bf16.msra.mxu1 %v1991_v37  ;;  %v480_v15 = vld [vmem:[#allocation8 + $0x370] sm:$0xff]  ;;  %v421_v18 = vld [vmem:[#allocation8 + $0x198] sm:$0xff]  ;;  %v307_v19 = vld [vmem:[%s2792_s24 + $0x8] sm:$0xff]  ;;  %v2007_v23 = vpack.c.bf16 %v416_v13, %v414_v10 }
  0x94   : > { %2056 = vmatpush1.bf16.msra.mxu0 %v2055_v38  ;;  %1994 = vmatprep.subr.bf16.mxu1 %v1993_v39  ;;  %v483_v20 = vld [vmem:[#allocation8 + $0x388] sm:$0xff]  ;;  %v485_v21 = vld [vmem:[#allocation8 + $0x398] sm:$0xff]  ;;  %v2071_v24 = vpack.c.bf16 %v480_v15, %v478_v14  ;;  %v2009_v25 = vpack.c.bf16 %v421_v18, %v419_v17  ;;  %v418_v26 = vld [vmem:[#allocation8 + $0x180] sm:$0xff] }
  0x95   : > { %2058 = vmatprep.subr.bf16.mxu0 %v2057_v43  ;;  %562 = vmatprep.mubr.f32.mxu1 %v307_v19  ;;  %v309_v22 = vld [vmem:[%s2792_s24 + $0x18] sm:$0xff]  ;;  %v420_v27 = vld [vmem:[#allocation8 + $0x190] sm:$0xff]  ;;  %v482_v28 = vld [vmem:[#allocation8 + $0x380] sm:$0xff]  ;;  %v2073_v29 = vpack.c.bf16 %v485_v21, %v483_v20 }
  0x96   : > { %723 = vmatprep.mubr.f32.mxu0 %v309_v22  ;;  %v484_v30 = vld [vmem:[#allocation8 + $0x390] sm:$0xff]  ;;  %v423_v31 = vld [vmem:[#allocation8 + $0x1a8] sm:$0xff]  ;;  %v425_v32 = vld [vmem:[#allocation8 + $0x1b8] sm:$0xff]  ;;  %v2011_v35 = vpack.c.bf16 %v420_v27, %v418_v26 }
  0x97   : > { %1996 = vmatpush1.bf16.msra.mxu1 %v1995_v49  ;;  %v487_v33 = vld [vmem:[#allocation8 + $0x3a8] sm:$0xff]  ;;  %v489_v34 = vld [vmem:[#allocation8 + $0x3b8] sm:$0xff]  ;;  %v2075_v36 = vpack.c.bf16 %v484_v30, %v482_v28  ;;  %v2013_v37 = vpack.c.bf16 %v425_v32, %v423_v31  ;;  %v422_v38 = vld [vmem:[#allocation8 + $0x1a0] sm:$0xff] }
  0x98   : > { %2060 = vmatpush1.bf16.msra.mxu0 %v2059_v50  ;;  %1998 = vmatprep.subr.bf16.mxu1 %v1997_v51  ;;  %v424_v39 = vld [vmem:[#allocation8 + $0x1b0] sm:$0xff]  ;;  %v486_v40 = vld [vmem:[#allocation8 + $0x3a0] sm:$0xff]  ;;  %v2077_v41 = vpack.c.bf16 %v489_v34, %v487_v33  ;;  %v427_v43 = vld [vmem:[#allocation8 + $0x1c8] sm:$0xff] }
  0x99   : > { %2062 = vmatprep.subr.bf16.mxu0 %v2061_v55  ;;  %v488_v42 = vld [vmem:[#allocation8 + $0x3b0] sm:$0xff]  ;;  %v429_v44 = vld [vmem:[#allocation8 + $0x1d8] sm:$0xff]  ;;  %v491_v45 = vld [vmem:[#allocation8 + $0x3c8] sm:$0xff]  ;;  %v2015_v47 = vpack.c.bf16 %v424_v39, %v422_v38 }
  0x9a   : > { %v493_v46 = vld [vmem:[#allocation8 + $0x3d8] sm:$0xff]  ;;  %v2079_v48 = vpack.c.bf16 %v488_v42, %v486_v40  ;;  %v2017_v49 = vpack.c.bf16 %v429_v44, %v427_v43  ;;  %v426_v50 = vld [vmem:[#allocation8 + $0x1c0] sm:$0xff]  ;;  %v428_v51 = vld [vmem:[#allocation8 + $0x1d0] sm:$0xff] }
  0x9b   : > { %2000 = vmatpush1.bf16.msra.mxu1 %v1999_v61  ;;  %v490_v52 = vld [vmem:[#allocation8 + $0x3c0] sm:$0xff]  ;;  %v2081_v53 = vpack.c.bf16 %v493_v46, %v491_v45  ;;  %v492_v54 = vld [vmem:[#allocation8 + $0x3d0] sm:$0xff]  ;;  %v431_v55 = vld [vmem:[#allocation8 + $0x1e8] sm:$0xff]  ;;  %v2019_v59 = vpack.c.bf16 %v428_v51, %v426_v50 }
  0x9c   : > { %2064 = vmatpush1.bf16.msra.mxu0 %v2063_v62  ;;  %2002 = vmatprep.subr.bf16.mxu1 %v2001_v63  ;;  %v433_v56 = vld [vmem:[#allocation8 + $0x1f8] sm:$0xff]  ;;  %v495_v57 = vld [vmem:[#allocation8 + $0x3e8] sm:$0xff]  ;;  %v2083_v60 = vpack.c.bf16 %v492_v54, %v490_v52  ;;  %v430_v62 = vld [vmem:[#allocation8 + $0x1e0] sm:$0xff] }
  0x9d   : > { %2066 = vmatprep.subr.bf16.mxu0 %v2065_v3  ;;  %v497_v58 = vld [vmem:[#allocation8 + $0x3f8] sm:$0xff]  ;;  %v2021_v61 = vpack.c.bf16 %v433_v56, %v431_v55  ;;  %v432_v63 = vld [vmem:[#allocation8 + $0x1f0] sm:$0xff]  ;;  %v494_v1 = vld [vmem:[#allocation8 + $0x3e0] sm:$0xff] }
  0x9e   : > { %v2085_v0 = vpack.c.bf16 %v497_v58, %v495_v57  ;;  %v496_v2 = vld [vmem:[#allocation8 + $0x3f0] sm:$0xff]  ;;  %v2023_v3 = vpack.c.bf16 %v432_v63, %v430_v62  ;;  %v306_v5 = vld [vmem:[%s2792_s24] sm:$0xff]  ;;  %v311_v7 = vld [vmem:[%s2792_s24 + $0x28] sm:$0xff] }
  0x9f   : > { %2004 = vmatpush1.bf16.msra.mxu1 %v2003_v9  ;;  %v2087_v4 = vpack.c.bf16 %v496_v2, %v494_v1  ;;  %v308_v6 = vld [vmem:[%s2792_s24 + $0x10] sm:$0xff]  ;;  %v313_v8 = vld [vmem:[%s2792_s24 + $0x38] sm:$0xff]  ;;  %v310_v9 = vld [vmem:[%s2792_s24 + $0x20] sm:$0xff] }
  0xa0   : > { %2068 = vmatpush1.bf16.msra.mxu0 %v2067_v11  ;;  %2006 = vmatprep.subr.bf16.mxu1 %v2005_v12  ;;  %v312_v10 = vld [vmem:[%s2792_s24 + $0x30] sm:$0xff]  ;;  %v315_v11 = vld [vmem:[%s2792_s24 + $0x48] sm:$0xff]  ;;  %v317_v12 = vld [vmem:[%s2792_s24 + $0x58] sm:$0xff] }
  0xa1   : > { %2070 = vmatprep.subr.bf16.mxu0 %v2069_v16  ;;  %v314_v13 = vld [vmem:[%s2792_s24 + $0x40] sm:$0xff]  ;;  %v316_v14 = vld [vmem:[%s2792_s24 + $0x50] sm:$0xff]  ;;  %v319_v15 = vld [vmem:[%s2792_s24 + $0x68] sm:$0xff] }
  0xa2   : > { %v321_v16 = vld [vmem:[%s2792_s24 + $0x78] sm:$0xff]  ;;  %v318_v17 = vld [vmem:[%s2792_s24 + $0x60] sm:$0xff]  ;;  %v320_v18 = vld [vmem:[%s2792_s24 + $0x70] sm:$0xff] }
  0xa3   : > { %2008 = vmatpush1.bf16.msra.mxu1 %v2007_v23  ;;  %v323_v19 = vld [vmem:[%s2792_s24 + $0x88] sm:$0xff]  ;;  %v325_v20 = vld [vmem:[%s2792_s24 + $0x98] sm:$0xff]  ;;  %v322_v21 = vld [vmem:[%s2792_s24 + $0x80] sm:$0xff] }
  0xa4   : > { %2072 = vmatpush1.bf16.msra.mxu0 %v2071_v24  ;;  %2010 = vmatprep.subr.bf16.mxu1 %v2009_v25  ;;  %v324_v22 = vld [vmem:[%s2792_s24 + $0x90] sm:$0xff]  ;;  %v327_v23 = vld [vmem:[%s2792_s24 + $0xa8] sm:$0xff]  ;;  %v329_v24 = vld [vmem:[%s2792_s24 + $0xb8] sm:$0xff] }
  0xa5   : > { %2074 = vmatprep.subr.bf16.mxu0 %v2073_v29  ;;  %v326_v25 = vld [vmem:[%s2792_s24 + $0xa0] sm:$0xff]  ;;  %v328_v26 = vld [vmem:[%s2792_s24 + $0xb0] sm:$0xff]  ;;  %v331_v27 = vld [vmem:[%s2792_s24 + $0xc8] sm:$0xff] }
  0xa6   : > { %v333_v28 = vld [vmem:[%s2792_s24 + $0xd8] sm:$0xff]  ;;  %v330_v29 = vld [vmem:[%s2792_s24 + $0xc0] sm:$0xff]  ;;  %v332_v30 = vld [vmem:[%s2792_s24 + $0xd0] sm:$0xff] }
  0xa7   : > { %2012 = vmatpush1.bf16.msra.mxu1 %v2011_v35  ;;  %v335_v31 = vld [vmem:[%s2792_s24 + $0xe8] sm:$0xff]  ;;  %v337_v32 = vld [vmem:[%s2792_s24 + $0xf8] sm:$0xff]  ;;  %v334_v33 = vld [vmem:[%s2792_s24 + $0xe0] sm:$0xff] }
  0xa8   : > { %2076 = vmatpush1.bf16.msra.mxu0 %v2075_v36  ;;  %2014 = vmatprep.subr.bf16.mxu1 %v2013_v37  ;;  %v336_v34 = vld [vmem:[%s2792_s24 + $0xf0] sm:$0xff]  ;;  %v339_v35 = vld [vmem:[%s2792_s24 + $0x108] sm:$0xff]  ;;  %v341_v36 = vld [vmem:[%s2792_s24 + $0x118] sm:$0xff] }
  0xa9   : > { %2078 = vmatprep.subr.bf16.mxu0 %v2077_v41  ;;  %v338_v37 = vld [vmem:[%s2792_s24 + $0x100] sm:$0xff]  ;;  %v340_v38 = vld [vmem:[%s2792_s24 + $0x110] sm:$0xff]  ;;  %v343_v39 = vld [vmem:[%s2792_s24 + $0x128] sm:$0xff] }
  0xaa   : > { %v345_v40 = vld [vmem:[%s2792_s24 + $0x138] sm:$0xff]  ;;  %v342_v41 = vld [vmem:[%s2792_s24 + $0x120] sm:$0xff]  ;;  %v344_v42 = vld [vmem:[%s2792_s24 + $0x130] sm:$0xff] }
  0xab   : > { %2016 = vmatpush1.bf16.msra.mxu1 %v2015_v47  ;;  %v347_v43 = vld [vmem:[%s2792_s24 + $0x148] sm:$0xff]  ;;  %v349_v44 = vld [vmem:[%s2792_s24 + $0x158] sm:$0xff]  ;;  %v346_v45 = vld [vmem:[%s2792_s24 + $0x140] sm:$0xff] }
  0xac   : > { %2080 = vmatpush1.bf16.msra.mxu0 %v2079_v48  ;;  %2018 = vmatprep.subr.bf16.mxu1 %v2017_v49  ;;  %v348_v46 = vld [vmem:[%s2792_s24 + $0x150] sm:$0xff]  ;;  %v351_v47 = vld [vmem:[%s2792_s24 + $0x168] sm:$0xff]  ;;  %v353_v48 = vld [vmem:[%s2792_s24 + $0x178] sm:$0xff] }
  0xad   : > { %2082 = vmatprep.subr.bf16.mxu0 %v2081_v53  ;;  %v350_v49 = vld [vmem:[%s2792_s24 + $0x160] sm:$0xff]  ;;  %v352_v50 = vld [vmem:[%s2792_s24 + $0x170] sm:$0xff]  ;;  %v355_v51 = vld [vmem:[%s2792_s24 + $0x188] sm:$0xff] }
  0xae   : > { %v357_v52 = vld [vmem:[%s2792_s24 + $0x198] sm:$0xff]  ;;  %v354_v53 = vld [vmem:[%s2792_s24 + $0x180] sm:$0xff]  ;;  %v356_v54 = vld [vmem:[%s2792_s24 + $0x190] sm:$0xff] }
  0xaf   : > { %2020 = vmatpush1.bf16.msra.mxu1 %v2019_v59  ;;  %v359_v55 = vld [vmem:[%s2792_s24 + $0x1a8] sm:$0xff]  ;;  %v361_v56 = vld [vmem:[%s2792_s24 + $0x1b8] sm:$0xff]  ;;  %v358_v57 = vld [vmem:[%s2792_s24 + $0x1a0] sm:$0xff] }
  0xb0   : > { %2084 = vmatpush1.bf16.msra.mxu0 %v2083_v60  ;;  %2022 = vmatprep.subr.bf16.mxu1 %v2021_v61  ;;  %v360_v58 = vld [vmem:[%s2792_s24 + $0x1b0] sm:$0xff]  ;;  %v363_v59 = vld [vmem:[%s2792_s24 + $0x1c8] sm:$0xff]  ;;  %v365_v60 = vld [vmem:[%s2792_s24 + $0x1d8] sm:$0xff] }
  0xb1   : > { %2086 = vmatprep.subr.bf16.mxu0 %v2085_v0  ;;  %v362_v61 = vld [vmem:[%s2792_s24 + $0x1c0] sm:$0xff]  ;;  %v364_v62 = vld [vmem:[%s2792_s24 + $0x1d0] sm:$0xff]  ;;  %v367_v63 = vld [vmem:[%s2792_s24 + $0x1e8] sm:$0xff] }
  0xb2   : > { %v369_v0 = vld [vmem:[%s2792_s24 + $0x1f8] sm:$0xff]  ;;  %v366_v1 = vld [vmem:[%s2792_s24 + $0x1e0] sm:$0xff]  ;;  %v368_v2 = vld [vmem:[%s2792_s24 + $0x1f0] sm:$0xff] }
  0xb3   : > { %2024 = vmatpush1.bf16.msra.mxu1 %v2023_v3  ;;  %v3729_v3 = vlaneseq }
  0xb4   : > { %2088 = vmatpush1.bf16.msra.mxu0 %v2087_v4 }
  0xb5   : > { %v2871_v4 = vshrl.u32 %v3729_v3, 7 }
  0xb6   : > { %563 = vmatmul.mubr.f32.vlgmr.msra.gmra.mrb[0].mxu1 %v306_v5 }
  0xb7   : > { %724 = vmatmul.mubr.f32.vlgmr.msra.gmra.mrb[0].mxu0 %v308_v6  ;;  %568 = vmatprep.mubr.f32.mxu1 %v311_v7  ;;  %v2874_v5 = vsub.s32 0, %v2871_v4  ;;  %v852_v6 = vld [vmem:[%s3718_s2] sm:$0x3]  ;;  %v860_v7 = vsub.s32 1, %v2871_v4 }
  0xb8   : > { %729 = vmatprep.mubr.f32.mxu0 %v313_v8 }
  0xb9   : > { %3743 = vst [vmem:[#allocation19_spill] sm:$0xff] %v2874_v5 }
  0xba   : > { %569 = vmatmul.mubr.f32.gmra.mrb[2].mxu1 %v310_v9 }
  0xbb   : > { %730 = vmatmul.mubr.f32.gmra.mrb[2].mxu0 %v312_v10  ;;  %574 = vmatprep.mubr.f32.mxu1 %v315_v11 }
  0xbc   : > { %735 = vmatprep.mubr.f32.mxu0 %v317_v12 }
  0xbe   : > { %575 = vmatmul.mubr.f32.gmra.mrb[4].mxu1 %v314_v13  ;;  %v2881_v13 = vrot.slane %v852_v6, %v2874_v5 }
  0xbf   : > { %736 = vmatmul.mubr.f32.gmra.mrb[4].mxu0 %v316_v14  ;;  %580 = vmatprep.mubr.f32.mxu1 %v319_v15  ;;  %v2883_v15 = vrot.slane %v852_v6, %v860_v7 }
  0xc0   : > { %741 = vmatprep.mubr.f32.mxu0 %v321_v16 }
  0xc2   : > { %581 = vmatmul.mubr.f32.gmra.mrb[6].mxu1 %v318_v17 }
  0xc3   : > { %742 = vmatmul.mubr.f32.gmra.mrb[6].mxu0 %v320_v18  ;;  %586 = vmatprep.mubr.f32.mxu1 %v323_v19 }
  0xc4   : > { %747 = vmatprep.mubr.f32.mxu0 %v325_v20 }
  0xc6   : > { %587 = vmatmul.mubr.f32.gmra.mrb[8].mxu1 %v322_v21 }
  0xc7   : > { %748 = vmatmul.mubr.f32.gmra.mrb[8].mxu0 %v324_v22  ;;  %592 = vmatprep.mubr.f32.mxu1 %v327_v23 }
  0xc8   : > { %753 = vmatprep.mubr.f32.mxu0 %v329_v24 }
  0xca   : > { %593 = vmatmul.mubr.f32.gmra.mrb[10].mxu1 %v326_v25 }
  0xcb   : > { %754 = vmatmul.mubr.f32.gmra.mrb[10].mxu0 %v328_v26  ;;  %598 = vmatprep.mubr.f32.mxu1 %v331_v27 }
  0xcc   : > { %759 = vmatprep.mubr.f32.mxu0 %v333_v28 }
  0xce   : > { %599 = vmatmul.mubr.f32.gmra.mrb[12].mxu1 %v330_v29 }
  0xcf   : > { %760 = vmatmul.mubr.f32.gmra.mrb[12].mxu0 %v332_v30  ;;  %604 = vmatprep.mubr.f32.mxu1 %v335_v31 }
  0xd0   : > { %765 = vmatprep.mubr.f32.mxu0 %v337_v32 }
  0xd2   : > { %605 = vmatmul.mubr.f32.gmra.mrb[14].mxu1 %v334_v33 }
  0xd3   : > { %766 = vmatmul.mubr.f32.gmra.mrb[14].mxu0 %v336_v34  ;;  %610 = vmatprep.mubr.f32.mxu1 %v339_v35 }
  0xd4   : > { %771 = vmatprep.mubr.f32.mxu0 %v341_v36 }
  0xd6   : > { %611 = vmatmul.mubr.f32.gmra.mrb[16].mxu1 %v338_v37 }
  0xd7   : > { %772 = vmatmul.mubr.f32.gmra.mrb[16].mxu0 %v340_v38  ;;  %616 = vmatprep.mubr.f32.mxu1 %v343_v39 }
  0xd8   : > { %777 = vmatprep.mubr.f32.mxu0 %v345_v40 }
  0xda   : > { %617 = vmatmul.mubr.f32.gmra.mrb[18].mxu1 %v342_v41 }
  0xdb   : > { %778 = vmatmul.mubr.f32.gmra.mrb[18].mxu0 %v344_v42  ;;  %622 = vmatprep.mubr.f32.mxu1 %v347_v43 }
  0xdc   : > { %783 = vmatprep.mubr.f32.mxu0 %v349_v44 }
  0xde   : > { %623 = vmatmul.mubr.f32.gmra.mrb[20].mxu1 %v346_v45 }
  0xdf   : > { %784 = vmatmul.mubr.f32.gmra.mrb[20].mxu0 %v348_v46  ;;  %628 = vmatprep.mubr.f32.mxu1 %v351_v47 }
  0xe0   : > { %789 = vmatprep.mubr.f32.mxu0 %v353_v48 }
  0xe2   : > { %629 = vmatmul.mubr.f32.gmra.mrb[22].mxu1 %v350_v49 }
  0xe3   : > { %790 = vmatmul.mubr.f32.gmra.mrb[22].mxu0 %v352_v50  ;;  %634 = vmatprep.mubr.f32.mxu1 %v355_v51 }
  0xe4   : > { %795 = vmatprep.mubr.f32.mxu0 %v357_v52 }
  0xe6   : > { %635 = vmatmul.mubr.f32.gmra.mrb[24].mxu1 %v354_v53 }
  0xe7   : > { %796 = vmatmul.mubr.f32.gmra.mrb[24].mxu0 %v356_v54  ;;  %640 = vmatprep.mubr.f32.mxu1 %v359_v55 }
  0xe8   : > { %801 = vmatprep.mubr.f32.mxu0 %v361_v56 }
  0xea   : > { %641 = vmatmul.mubr.f32.gmra.mrb[26].mxu1 %v358_v57 }
  0xeb   : > { %802 = vmatmul.mubr.f32.gmra.mrb[26].mxu0 %v360_v58  ;;  %646 = vmatprep.mubr.f32.mxu1 %v363_v59 }
  0xec   : > { %807 = vmatprep.mubr.f32.mxu0 %v365_v60 }
  0xee   : > { %647 = vmatmul.mubr.f32.gmra.mrb[28].mxu1 %v362_v61 }
  0xef   : > { %808 = vmatmul.mubr.f32.gmra.mrb[28].mxu0 %v364_v62  ;;  %652 = vmatprep.mubr.f32.mxu1 %v367_v63 }
  0xf0   : > { %813 = vmatprep.mubr.f32.mxu0 %v369_v0 }
  0xf2   : > { %653 = vmatmul.mubr.f32.gmra.mrb[30].mxu1 %v366_v1 }
  0xf3   : > { %814 = vmatmul.mubr.f32.gmra.mrb[30].mxu0 %v368_v2 }
 0x189   : > { %v564_v8 = vpop.f32.mrb[0].mxu1 }
 0x18a   : > { %v725_v9 = vpop.f32.mrb[0].mxu0  ;;  %v566_v10 = vpop.f32.mrb[1].mxu1 }
 0x18b   : > { %v726_v11 = vadd.f32 %v725_v9, %v564_v8  ;;  %v727_v12 = vpop.f32.mrb[1].mxu0 }
 0x18c   : > { %v728_v14 = vadd.f32 %v727_v12, %v566_v10 }
 0x18d   : > { %v820_v16 = vmax.f32 %v726_v11, 0.0  ;;  %v570_v17 = vpop.f32.mrb[2].mxu1 }
 0x18e   : > { %v821_v18 = vmax.f32 %v728_v14, 0.0  ;;  %v731_v19 = vpop.f32.mrb[2].mxu0  ;;  %v572_v20 = vpop.f32.mrb[3].mxu1 }
 0x18f   : > { %v732_v21 = vadd.f32 %v731_v19, %v570_v17  ;;  %v733_v22 = vpop.f32.mrb[3].mxu0  ;;  %v864_v23 = vmul.f32 %v2881_v13, %v820_v16 }
 0x190   : > { %v734_v24 = vadd.f32 %v733_v22, %v572_v20  ;;  %v865_v25 = vmul.f32 %v2883_v15, %v821_v18 }
 0x191   : > { %v822_v26 = vmax.f32 %v732_v21, 0.0  ;;  %v576_v27 = vpop.f32.mrb[4].mxu1 }
 0x192   : > { %v823_v28 = vmax.f32 %v734_v24, 0.0  ;;  %v737_v29 = vpop.f32.mrb[4].mxu0  ;;  %v578_v30 = vpop.f32.mrb[5].mxu1  ;;  %v896_v31 = vadd.f32 %v865_v25, %v864_v23 }
 0x193   : > { %v866_v32 = vmul.f32 %v2881_v13, %v822_v26  ;;  %v738_v33 = vadd.f32 %v737_v29, %v576_v27  ;;  %v739_v34 = vpop.f32.mrb[5].mxu0 }
 0x194   : > { %v867_v35 = vmul.f32 %v2883_v15, %v823_v28  ;;  %v740_v36 = vadd.f32 %v739_v34, %v578_v30  ;;  %897 = vadd.xlane.f32.xlu0 %v896_v31 }
 0x195   : > { %v824_v37 = vmax.f32 %v738_v33, 0.0  ;;  %v582_v38 = vpop.f32.mrb[6].mxu1 }
 0x196   : > { %v825_v39 = vmax.f32 %v740_v36, 0.0  ;;  %v743_v40 = vpop.f32.mrb[6].mxu0  ;;  %v584_v41 = vpop.f32.mrb[7].mxu1  ;;  %v899_v42 = vadd.f32 %v867_v35, %v866_v32 }
 0x197   : > { %v744_v43 = vadd.f32 %v743_v40, %v582_v38  ;;  %v745_v44 = vpop.f32.mrb[7].mxu0  ;;  %v868_v45 = vmul.f32 %v2881_v13, %v824_v37 }
 0x198   : > { %v746_v46 = vadd.f32 %v745_v44, %v584_v41  ;;  %900 = vadd.xlane.f32.xlu0 %v899_v42  ;;  %v869_v47 = vmul.f32 %v2883_v15, %v825_v39 }
 0x199   : > { %v826_v48 = vmax.f32 %v744_v43, 0.0  ;;  %v588_v49 = vpop.f32.mrb[8].mxu1 }
 0x19a   : > { %v827_v50 = vmax.f32 %v746_v46, 0.0  ;;  %v749_v51 = vpop.f32.mrb[8].mxu0  ;;  %v590_v52 = vpop.f32.mrb[9].mxu1  ;;  %v902_v53 = vadd.f32 %v869_v47, %v868_v45 }
 0x19b   : > { %v870_v54 = vmul.f32 %v2881_v13, %v826_v48  ;;  %v750_v55 = vadd.f32 %v749_v51, %v588_v49  ;;  %v751_v56 = vpop.f32.mrb[9].mxu0 }
 0x19c   : > { %v871_v57 = vmul.f32 %v2883_v15, %v827_v50  ;;  %v752_v58 = vadd.f32 %v751_v56, %v590_v52  ;;  %903 = vadd.xlane.f32.xlu1 %v902_v53 }
 0x19d   : > { %v828_v59 = vmax.f32 %v750_v55, 0.0  ;;  %v594_v60 = vpop.f32.mrb[10].mxu1 }
 0x19e   : > { %v829_v61 = vmax.f32 %v752_v58, 0.0  ;;  %v755_v62 = vpop.f32.mrb[10].mxu0  ;;  %v596_v63 = vpop.f32.mrb[11].mxu1  ;;  %v905_v0 = vadd.f32 %v871_v57, %v870_v54 }
 0x19f   : > { %v872_v1 = vmul.f32 %v2881_v13, %v828_v59  ;;  %v756_v2 = vadd.f32 %v755_v62, %v594_v60  ;;  %v757_v6 = vpop.f32.mrb[11].mxu0 }
 0x1a0   : > { %v873_v7 = vmul.f32 %v2883_v15, %v829_v61  ;;  %v758_v8 = vadd.f32 %v757_v6, %v596_v63  ;;  %906 = vadd.xlane.f32.xlu1 %v905_v0 }
 0x1a1   : > { %v830_v9 = vmax.f32 %v756_v2, 0.0  ;;  %v600_v10 = vpop.f32.mrb[12].mxu1 }
 0x1a2   : > { %v831_v11 = vmax.f32 %v758_v8, 0.0  ;;  %v761_v12 = vpop.f32.mrb[12].mxu0  ;;  %v602_v14 = vpop.f32.mrb[13].mxu1  ;;  %v908_v16 = vadd.f32 %v873_v7, %v872_v1 }
 0x1a3   : > { %v874_v17 = vmul.f32 %v2881_v13, %v830_v9  ;;  %v762_v18 = vadd.f32 %v761_v12, %v600_v10  ;;  %v763_v19 = vpop.f32.mrb[13].mxu0 }
 0x1a4   : > { %v875_v20 = vmul.f32 %v2883_v15, %v831_v11  ;;  %v764_v21 = vadd.f32 %v763_v19, %v602_v14  ;;  %909 = vadd.xlane.f32.xlu0 %v908_v16 }
 0x1a5   : > { %v832_v22 = vmax.f32 %v762_v18, 0.0  ;;  %v606_v23 = vpop.f32.mrb[14].mxu1 }
 0x1a6   : > { %v833_v24 = vmax.f32 %v764_v21, 0.0  ;;  %v767_v25 = vpop.f32.mrb[14].mxu0  ;;  %v608_v26 = vpop.f32.mrb[15].mxu1  ;;  %v911_v27 = vadd.f32 %v875_v20, %v874_v17 }
 0x1a7   : > { %v876_v28 = vmul.f32 %v2881_v13, %v832_v22  ;;  %v768_v29 = vadd.f32 %v767_v25, %v606_v23  ;;  %v769_v30 = vpop.f32.mrb[15].mxu0 }
 0x1a8   : > { %v877_v31 = vmul.f32 %v2883_v15, %v833_v24  ;;  %v770_v32 = vadd.f32 %v769_v30, %v608_v26  ;;  %912 = vadd.xlane.f32.xlu1 %v911_v27 }
 0x1a9   : > { %v834_v33 = vmax.f32 %v768_v29, 0.0  ;;  %v612_v34 = vpop.f32.mrb[16].mxu1 }
 0x1aa   : > { %v835_v35 = vmax.f32 %v770_v32, 0.0  ;;  %v773_v36 = vpop.f32.mrb[16].mxu0  ;;  %v614_v37 = vpop.f32.mrb[17].mxu1  ;;  %v914_v38 = vadd.f32 %v877_v31, %v876_v28 }
 0x1ab   : > { %v878_v39 = vmul.f32 %v2881_v13, %v834_v33  ;;  %v774_v40 = vadd.f32 %v773_v36, %v612_v34  ;;  %v775_v41 = vpop.f32.mrb[17].mxu0 }
 0x1ac   : > { %v879_v42 = vmul.f32 %v2883_v15, %v835_v35  ;;  %v776_v43 = vadd.f32 %v775_v41, %v614_v37  ;;  %915 = vadd.xlane.f32.xlu0 %v914_v38 }
 0x1ad   : > { %v836_v44 = vmax.f32 %v774_v40, 0.0  ;;  %v618_v45 = vpop.f32.mrb[18].mxu1 }
 0x1ae   : > { %v837_v46 = vmax.f32 %v776_v43, 0.0  ;;  %v779_v47 = vpop.f32.mrb[18].mxu0  ;;  %v620_v48 = vpop.f32.mrb[19].mxu1  ;;  %v917_v49 = vadd.f32 %v879_v42, %v878_v39 }
 0x1af   : > { %v880_v50 = vmul.f32 %v2881_v13, %v836_v44  ;;  %v780_v51 = vadd.f32 %v779_v47, %v618_v45  ;;  %v781_v52 = vpop.f32.mrb[19].mxu0 }
 0x1b0   : > { %v881_v53 = vmul.f32 %v2883_v15, %v837_v46  ;;  %v782_v54 = vadd.f32 %v781_v52, %v620_v48  ;;  %918 = vadd.xlane.f32.xlu1 %v917_v49 }
 0x1b1   : > { %v838_v55 = vmax.f32 %v780_v51, 0.0  ;;  %v624_v56 = vpop.f32.mrb[20].mxu1 }
 0x1b2   : > { %v839_v57 = vmax.f32 %v782_v54, 0.0  ;;  %v785_v58 = vpop.f32.mrb[20].mxu0  ;;  %v626_v59 = vpop.f32.mrb[21].mxu1  ;;  %v920_v60 = vadd.f32 %v881_v53, %v880_v50 }
 0x1b3   : > { %v882_v61 = vmul.f32 %v2881_v13, %v838_v55  ;;  %v786_v62 = vadd.f32 %v785_v58, %v624_v56  ;;  %v787_v63 = vpop.f32.mrb[21].mxu0 }
 0x1b4   : > { %v883_v0 = vmul.f32 %v2883_v15, %v839_v57  ;;  %v788_v1 = vadd.f32 %v787_v63, %v626_v59  ;;  %921 = vadd.xlane.f32.xlu0 %v920_v60 }
 0x1b5   : > { %v840_v2 = vmax.f32 %v786_v62, 0.0  ;;  %v630_v6 = vpop.f32.mrb[22].mxu1 }
 0x1b6   : > { %v841_v7 = vmax.f32 %v788_v1, 0.0  ;;  %v791_v8 = vpop.f32.mrb[22].mxu0  ;;  %v632_v9 = vpop.f32.mrb[23].mxu1  ;;  %v923_v10 = vadd.f32 %v883_v0, %v882_v61 }
 0x1b7   : > { %v884_v11 = vmul.f32 %v2881_v13, %v840_v2  ;;  %v792_v12 = vadd.f32 %v791_v8, %v630_v6  ;;  %v793_v14 = vpop.f32.mrb[23].mxu0 }
 0x1b8   : > { %v885_v16 = vmul.f32 %v2883_v15, %v841_v7  ;;  %v794_v17 = vadd.f32 %v793_v14, %v632_v9  ;;  %924 = vadd.xlane.f32.xlu1 %v923_v10  ;;  %v2920_v7 = vstv %s1930_s21  ;;  %v947_v9 = vadd.s32 8, %v2871_v4 }
 0x1b9   : > { %v842_v18 = vmax.f32 %v792_v12, 0.0  ;;  %v636_v19 = vpop.f32.mrb[24].mxu1  ;;  %v2924_v8 = vadd.s32 %v2920_v7, %v2871_v4  ;;  %v949_v14 = vadd.s32 24, %v2871_v4 }
 0x1ba   : > { %v843_v20 = vmax.f32 %v794_v17, 0.0  ;;  %v797_v21 = vpop.f32.mrb[24].mxu0  ;;  %v638_v22 = vpop.f32.mrb[25].mxu1  ;;  %v926_v23 = vadd.f32 %v885_v16, %v884_v11 }
 0x1bb   : > { %v886_v24 = vmul.f32 %v2881_v13, %v842_v18  ;;  %v798_v25 = vadd.f32 %v797_v21, %v636_v19  ;;  %v799_v26 = vpop.f32.mrb[25].mxu0  ;;  %vm979_vm2 = vcmp.lt.s32.totalorder %v2924_v8, 300  ;;  %v2953_v18 = vadd.s32 %v2920_v7, %v949_v14 }
 0x1bc   : > { %v887_v27 = vmul.f32 %v2883_v15, %v843_v20  ;;  %v800_v28 = vadd.f32 %v799_v26, %v638_v22  ;;  %927 = vadd.xlane.f32.xlu0 %v926_v23  ;;  %v950_v19 = vadd.s32 32, %v2871_v4  ;;  %v951_v23 = vadd.s32 40, %v2871_v4 }
 0x1bd   : > { %v844_v29 = vmax.f32 %v798_v25, 0.0  ;;  %v642_v30 = vpop.f32.mrb[26].mxu1  ;;  %vm982_vm6 = vcmp.lt.s32.totalorder %v2953_v18, 300  ;;  %v2316_v18 = vld [vmem:[%s2792_s24 + $0xa8] sm:$0xff] }
 0x1be   : > { %v845_v31 = vmax.f32 %v800_v28, 0.0  ;;  %v803_v32 = vpop.f32.mrb[26].mxu0  ;;  %v644_v33 = vpop.f32.mrb[27].mxu1  ;;  %v929_v34 = vadd.f32 %v887_v27, %v886_v24  ;;  %v2965_v22 = vadd.s32 %v2920_v7, %v950_v19  ;;  %v2620_v24 = vmov 0  }
 0x1bf   : > { %v888_v35 = vmul.f32 %v2881_v13, %v844_v29  ;;  %v804_v36 = vadd.f32 %v803_v32, %v642_v30  ;;  %v805_v37 = vpop.f32.mrb[27].mxu0  ;;  %2263 = vset.pattern.permute.xlu1 %v2620_v24  ;;  %2264 = vset.pattern.permute.xlu0 %v2620_v24  ;;  %v2977_v27 = vadd.s32 %v2920_v7, %v951_v23  ;;  %v952_v28 = vadd.s32 48, %v2871_v4 }
 0x1c0   : > { %v889_v38 = vmul.f32 %v2883_v15, %v845_v31  ;;  %v806_v39 = vadd.f32 %v805_v37, %v644_v33  ;;  %930 = vadd.xlane.f32.xlu1 %v929_v34  ;;  %vm983_vm7 = vcmp.lt.s32.totalorder %v2965_v22, 300  ;;  %v953_v32 = vadd.s32 56, %v2871_v4 }
 0x1c1   : > { %v846_v40 = vmax.f32 %v804_v36, 0.0  ;;  %v648_v41 = vpop.f32.mrb[28].mxu1  ;;  %vm984_vm8 = vcmp.lt.s32.totalorder %v2977_v27, 300  ;;  %v2989_v31 = vadd.s32 %v2920_v7, %v952_v28  ;;  %v954_v36 = vadd.s32 64, %v2871_v4 }
 0x1c2   : > { %v847_v42 = vmax.f32 %v806_v39, 0.0  ;;  %v809_v43 = vpop.f32.mrb[28].mxu0  ;;  %v650_v44 = vpop.f32.mrb[29].mxu1  ;;  %v932_v45 = vadd.f32 %v889_v38, %v888_v35  ;;  %v3001_v35 = vadd.s32 %v2920_v7, %v953_v32 }
 0x1c3   : > { %v890_v46 = vmul.f32 %v2881_v13, %v846_v40  ;;  %v810_v47 = vadd.f32 %v809_v43, %v648_v41  ;;  %v811_v48 = vpop.f32.mrb[29].mxu0  ;;  %vm985_vm9 = vcmp.lt.s32.totalorder %v2989_v31, 300  ;;  %v3013_v39 = vadd.s32 %v2920_v7, %v954_v36 }
 0x1c4   : > { %v891_v49 = vmul.f32 %v2883_v15, %v847_v42  ;;  %v812_v50 = vadd.f32 %v811_v48, %v650_v44  ;;  %933 = vadd.xlane.f32.xlu0 %v932_v45  ;;  %vm986_vm10 = vcmp.lt.s32.totalorder %v3001_v35, 300  ;;  %v955_v40 = vadd.s32 72, %v2871_v4 }
 0x1c5   : > { %v848_v51 = vmax.f32 %v810_v47, 0.0  ;;  %v654_v52 = vpop.f32.mrb[30].mxu1  ;;  %vm987_vm11 = vcmp.lt.s32.totalorder %v3013_v39, 300  ;;  %v956_v44 = vadd.s32 80, %v2871_v4  ;;  %v957_v48 = vadd.s32 88, %v2871_v4 }
 0x1c6   : > { %v849_v53 = vmax.f32 %v812_v50, 0.0  ;;  %v815_v54 = vpop.f32.mrb[30].mxu0  ;;  %v656_v55 = vpop.f32.mrb[31].mxu1  ;;  %v935_v56 = vadd.f32 %v891_v49, %v890_v46  ;;  %v3025_v43 = vadd.s32 %v2920_v7, %v955_v40 }
 0x1c7   : > { %v892_v57 = vmul.f32 %v2881_v13, %v848_v51  ;;  %v816_v58 = vadd.f32 %v815_v54, %v654_v52  ;;  %v817_v59 = vpop.f32.mrb[31].mxu0  ;;  %v3037_v47 = vadd.s32 %v2920_v7, %v956_v44  ;;  %v3049_v51 = vadd.s32 %v2920_v7, %v957_v48 }
 0x1c8   : > { %v893_v60 = vmul.f32 %v2883_v15, %v849_v53  ;;  %v818_v61 = vadd.f32 %v817_v59, %v656_v55  ;;  %936 = vadd.xlane.f32.xlu1 %v935_v56  ;;  %vm988_vm12 = vcmp.lt.s32.totalorder %v3025_v43, 300  ;;  %v958_v52 = vadd.s32 96, %v2871_v4 }
 0x1c9   : > { %v850_v62 = vmax.f32 %v816_v58, 0.0  ;;  %vm989_vm13 = vcmp.lt.s32.totalorder %v3037_v47, 300  ;;  %vm990_vm14 = vcmp.lt.s32.totalorder %v3049_v51, 300  ;;  %v959_v56 = vadd.s32 104, %v2871_v4 }
 0x1ca   : > { %v851_v63 = vmax.f32 %v818_v61, 0.0  ;;  %v938_v0 = vadd.f32 %v893_v60, %v892_v57  ;;  %v3061_v55 = vadd.s32 %v2920_v7, %v958_v52  ;;  %v960_v60 = vadd.s32 112, %v2871_v4 }
 0x1cb   : > { %v894_v1 = vmul.f32 %v2881_v13, %v850_v62  ;;  %v2929_v13 = vadd.s32 %v2920_v7, %v947_v9  ;;  %v3073_v59 = vadd.s32 %v2920_v7, %v959_v56  ;;  %v3130_v56 = vld [vmem:[#allocation2] sm:$0x1] }
 0x1cc   : > { %v895_v2 = vmul.f32 %v2883_v15, %v851_v63  ;;  %939 = vadd.xlane.f32.xlu0 %v938_v0  ;;  %v948_v15 = vadd.s32 16, %v2871_v4  ;;  %vm3727_vm15 = vcmp.lt.s32.totalorder %v3061_v55, 300  ;;  %v961_v63 = vadd.s32 120, %v2871_v4 }
 0x1cd   : > { %vm980_vm4 = vcmp.lt.s32.totalorder %v2929_v13, 300  ;;  %vm992_vm0 = vcmp.lt.s32.totalorder %v3073_v59, 300  ;;  %v3086_v0 = vadd.s32 %v2920_v7, %v960_v60  ;;  %v2349_v59 = vld [vmem:[%s2792_s24 + $0x150] sm:$0xff] }
 0x1ce   : > { %v941_v6 = vadd.f32 %v895_v2, %v894_v1  ;;  %v2941_v12 = vadd.s32 %v2920_v7, %v948_v15 }
 0x1cf   : > { %vm993_vm1 = vcmp.lt.s32.totalorder %v3086_v0, 300 }
 0x1d0   : > { %942 = vadd.xlane.f32.xlu1 %v941_v6  ;;  %vm981_vm5 = vcmp.lt.s32.totalorder %v2941_v12, 300  ;;  %v3093_v6 = vadd.s32 %v2920_v7, %v961_v63 }
 0x221   : > { %v898_v10 = vpop.xlane.xlu0 %897 }
 0x222   : > { %v2934_v11 = vsel %vm979_vm2, %v898_v10, -1e+30 }
 0x223   : > { %1012 = vst.msk [vmem:[%s2802_s17] sm:$0xff] %vm1011_vm3, %v2934_v11 }
 0x225   : > { %v901_v16 = vpop.xlane.xlu0 %900 }
 0x226   : > { %v2946_v17 = vsel %vm980_vm4, %v901_v16, -1e+30 }
 0x227   : > { %1013 = vst.msk [vmem:[%s2802_s17 + $0x8] sm:$0xff] %vm1011_vm3, %v2946_v17 }
 0x229   : > { %v904_v20 = vpop.xlane.xlu1 %903 }
 0x22a   : > { %v2958_v21 = vsel %vm981_vm5, %v904_v20, -1e+30 }
 0x22b   : > { %1014 = vst.msk [vmem:[%s2802_s17 + $0x10] sm:$0xff] %vm1011_vm3, %v2958_v21 }
 0x22d   : > { %v907_v25 = vpop.xlane.xlu1 %906 }
 0x22e   : > { %v2970_v26 = vsel %vm982_vm6, %v907_v25, -1e+30 }
 0x22f   : > { %1015 = vst.msk [vmem:[%s2802_s17 + $0x18] sm:$0xff] %vm1011_vm3, %v2970_v26 }
 0x231   : > { %v910_v29 = vpop.xlane.xlu0 %909 }
 0x232   : > { %v2982_v30 = vsel %vm983_vm7, %v910_v29, -1e+30 }
 0x233   : > { %1016 = vst.msk [vmem:[%s2802_s17 + $0x20] sm:$0xff] %vm1011_vm3, %v2982_v30  ;;  %v1029_v7 = vmax.f32 %v2934_v11, %v2982_v30 }
 0x235   : > { %v913_v33 = vpop.xlane.xlu1 %912 }
 0x236   : > { %v2994_v34 = vsel %vm984_vm8, %v913_v33, -1e+30 }
 0x237   : > { %1017 = vst.msk [vmem:[%s2802_s17 + $0x28] sm:$0xff] %vm1011_vm3, %v2994_v34  ;;  %v1030_v9 = vmax.f32 %v2946_v17, %v2994_v34 }
 0x239   : > { %v916_v37 = vpop.xlane.xlu0 %915 }
 0x23a   : > { %v3006_v38 = vsel %vm985_vm9, %v916_v37, -1e+30 }
 0x23b   : > { %1018 = vst.msk [vmem:[%s2802_s17 + $0x30] sm:$0xff] %vm1011_vm3, %v3006_v38  ;;  %v1031_v14 = vmax.f32 %v2958_v21, %v3006_v38 }
 0x23d   : > { %v919_v41 = vpop.xlane.xlu1 %918 }
 0x23e   : > { %v3018_v42 = vsel %vm986_vm10, %v919_v41, -1e+30 }
 0x23f   : > { %1019 = vst.msk [vmem:[%s2802_s17 + $0x38] sm:$0xff] %vm1011_vm3, %v3018_v42  ;;  %v1032_v16 = vmax.f32 %v2970_v26, %v3018_v42 }
 0x241   : > { %v922_v45 = vpop.xlane.xlu0 %921 }
 0x242   : > { %v3030_v46 = vsel %vm987_vm11, %v922_v45, -1e+30 }
 0x243   : > { %1020 = vst.msk [vmem:[%s2802_s17 + $0x40] sm:$0xff] %vm1011_vm3, %v3030_v46  ;;  %v1033_v20 = vmax.f32 %v1029_v7, %v3030_v46 }
 0x245   : > { %v925_v49 = vpop.xlane.xlu1 %924 }
 0x246   : > { %v3042_v50 = vsel %vm988_vm12, %v925_v49, -1e+30 }
 0x247   : > { %1021 = vst.msk [vmem:[%s2802_s17 + $0x48] sm:$0xff] %vm1011_vm3, %v3042_v50  ;;  %v1034_v19 = vmax.f32 %v1030_v9, %v3042_v50 }
 0x249   : > { %v928_v53 = vpop.xlane.xlu0 %927 }
 0x24a   : > { %v3054_v54 = vsel %vm989_vm13, %v928_v53, -1e+30 }
 0x24b   : > { %1022 = vst.msk [vmem:[%s2802_s17 + $0x50] sm:$0xff] %vm1011_vm3, %v3054_v54  ;;  %v1035_v23 = vmax.f32 %v1031_v14, %v3054_v54 }
 0x24d   : > { %v931_v57 = vpop.xlane.xlu1 %930 }
 0x24e   : > { %v3066_v58 = vsel %vm990_vm14, %v931_v57, -1e+30 }
 0x24f   : > { %1023 = vst.msk [vmem:[%s2802_s17 + $0x58] sm:$0xff] %vm1011_vm3, %v3066_v58  ;;  %v1036_v24 = vmax.f32 %v1032_v16, %v3066_v58 }
 0x251   : > { %v934_v61 = vpop.xlane.xlu0 %933 }
 0x252   : > { %v3078_v62 = vsel %vm3727_vm15, %v934_v61, -1e+30  ;;  %vm3728_vm15 = vcmp.lt.s32.totalorder %v3093_v6, 300 }
 0x253   : > { %1024 = vst.msk [vmem:[%s2802_s17 + $0x60] sm:$0xff] %vm1011_vm3, %v3078_v62  ;;  %v1037_v32 = vmax.f32 %v1033_v20, %v3078_v62 }
 0x255   : > { %v937_v1 = vpop.xlane.xlu1 %936 }
 0x256   : > { %v3090_v2 = vsel %vm992_vm0, %v937_v1, -1e+30 }
 0x257   : > { %1025 = vst.msk [vmem:[%s2802_s17 + $0x68] sm:$0xff] %vm1011_vm3, %v3090_v2  ;;  %v1038_v25 = vmax.f32 %v1034_v19, %v3090_v2 }
 0x259   : > { %v940_v15 = vpop.xlane.xlu0 %939  ;;  %v1041_v37 = vmax.f32 %v1037_v32, %v1038_v25 }
 0x25a   : > { %v3103_v10 = vsel %vm993_vm1, %v940_v15, -1e+30 }
 0x25b   : > { %1026 = vst.msk [vmem:[%s2802_s17 + $0x70] sm:$0xff] %vm1011_vm3, %v3103_v10  ;;  %v1039_v33 = vmax.f32 %v1035_v23, %v3103_v10 }
 0x25d   : > { %v943_v28 = vpop.xlane.xlu1 %942 }
 0x25e   : > { %v3122_v29 = vsel %vm3728_vm15, %v943_v28, -1e+30  ;;  %vm1154_vm15 = vcmask 0  }
 0x25f   : > { %1027 = vst.msk [vmem:[%s2802_s17 + $0x78] sm:$0xff] %vm1011_vm3, %v3122_v29  ;;  %v1040_v36 = vmax.f32 %v1036_v24, %v3122_v29 }
 0x261   : > { %v1042_v40 = vmax.f32 %v1039_v33, %v1040_v36 }
 0x263   : > { %v1043_v41 = vmax.f32 %v1041_v37, %v1042_v40 }
 0x265   : > { %v1044_v44 = vrot.slane %v1043_v41, 4 }
 0x267   : > { %v1045_v45 = vmax.f32 %v1043_v41, %v1044_v44 }
 0x269   : > { %v1046_v48 = vrot.slane %v1045_v45, 2 }
 0x26b   : > { %v1047_v49 = vmax.f32 %v1045_v45, %v1046_v48 }
 0x26d   : > { %v1048_v52 = vrot.slane %v1047_v49, 1 }
 0x26f   : > { %v1049_v53 = vmax.f32 %v1047_v49, %v1048_v52 }
 0x271   : > { %2121 = vpush %v1049_v53 }
 0x2a2   : > { %s2122_s27 = spop %2121 }
 0x2a3   : > { %v1051_v57 = vstv %s2122_s27 }
 0x2a4   : > { %v3133_v60 = vmax.f32 %v3130_v56, %v1051_v57 }
 0x2a6   : > { %v1053_v61 = vsub.f32 %v3130_v56, %v3133_v60  ;;  %v3139_v63 = vrot.slane %v3133_v60, %v2874_v5  ;;  %1526 = vst.msk [vmem:[#allocation2] sm:$0x1] %vm1154_vm15, %v3133_v60 }
 0x2a8   : > { %v1062_v1 = vsub.f32 %v2934_v11, %v3139_v63  ;;  %v1064_v9 = vsub.f32 %v2958_v21, %v3139_v63  ;;  %v1065_v7 = vsub.f32 %v2970_v26, %v3139_v63  ;;  %v1063_v16 = vsub.f32 %v2946_v17, %v3139_v63 }
 0x2a9   : > { %v1066_v20 = vsub.f32 %v2982_v30, %v3139_v63  ;;  %v1067_v11 = vsub.f32 %v2994_v34, %v3139_v63  ;;  %v1068_v24 = vsub.f32 %v3006_v38, %v3139_v63  ;;  %v1069_v17 = vsub.f32 %v3018_v42, %v3139_v63 }
 0x2aa   : > { %v1078_v15 = vmul.f32 1.442695, %v1062_v1  ;;  %v1082_v14 = vmul.f32 1.442695, %v1064_v9  ;;  %v1084_v19 = vmul.f32 1.442695, %v1065_v7  ;;  %v1070_v30 = vsub.f32 %v3030_v46, %v3139_v63 }
 0x2ab   : > { %v1080_v23 = vmul.f32 1.442695, %v1063_v16  ;;  %v1086_v21 = vmul.f32 1.442695, %v1066_v20  ;;  %v1088_v25 = vmul.f32 1.442695, %v1067_v11  ;;  %v1071_v33 = vsub.f32 %v3042_v50, %v3139_v63 }
 0x2ac   : > { %2265 = vpow2.f32 %v1078_v15  ;;  %v1090_v28 = vmul.f32 1.442695, %v1068_v24  ;;  %v1092_v34 = vmul.f32 1.442695, %v1069_v17  ;;  %v1094_v38 = vmul.f32 1.442695, %v1070_v30 }
 0x2ad   : > { %2267 = vpow2.f32 %v1082_v14  ;;  %v1072_v36 = vsub.f32 %v3054_v54, %v3139_v63  ;;  %v1073_v46 = vsub.f32 %v3066_v58, %v3139_v63  ;;  %v1096_v41 = vmul.f32 1.442695, %v1071_v33 }
 0x2ae   : > { %2269 = vpow2.f32 %v1084_v19  ;;  %v1074_v44 = vsub.f32 %v3078_v62, %v3139_v63  ;;  %v1075_v52 = vsub.f32 %v3090_v2, %v3139_v63  ;;  %v1076_v9 = vsub.f32 %v3103_v10, %v3139_v63 }
 0x2af   : > { %2271 = vpow2.f32 %v1080_v23  ;;  %v1098_v45 = vmul.f32 1.442695, %v1072_v36  ;;  %v1100_v53 = vmul.f32 1.442695, %v1073_v46  ;;  %v1077_v16 = vsub.f32 %v3122_v29, %v3139_v63 }
 0x2b0   : > { %2273 = vpow2.f32 %v1086_v21  ;;  %v1102_v62 = vmul.f32 1.442695, %v1074_v44  ;;  %v1104_v2 = vmul.f32 1.442695, %v1075_v52  ;;  %v1106_v11 = vmul.f32 1.442695, %v1076_v9 }
 0x2b1   : > { %2275 = vpow2.f32 %v1088_v25  ;;  %v1054_v9 = vmul.f32 1.442695, %v1053_v61  ;;  %v2299_v61 = vld [vmem:[%s2792_s24] sm:$0xff] }
 0x2b2   : > { %2277 = vpow2.f32 %v1090_v28 }
 0x2b3   : > { %2279 = vpow2.f32 %v1092_v34 }
 0x2b4   : > { %2281 = vpow2.f32 %v1094_v38 }
 0x2b5   : > { %2283 = vpow2.f32 %v1096_v41 }
 0x2b6   : > { %v2266_v26 = vpop.eup %2265  ;;  %2285 = vpow2.f32 %v1098_v45 }
 0x2b7   : > { %1158 = vperm.xlu1 %2263, %v2266_v26   ;;  %v2268_v32 = vpop.eup %2267  ;;  %v1112_v42 = vsel %vm1011_vm3, %v2266_v26, 0.0  ;;  %2287 = vpow2.f32 %v1100_v53  ;;  %v1108_v26 = vmul.f32 1.442695, %v1077_v16 }
 0x2b8   : > { %v2270_v37 = vpop.eup %2269  ;;  %v1115_v48 = vsel %vm1011_vm3, %v2268_v32, 0.0  ;;  %2289 = vpow2.f32 %v1102_v62 }
 0x2b9   : > { %v3166_v40 = vpop.eup %2271  ;;  %v1117_v57 = vsel %vm1011_vm3, %v2270_v37, 0.0  ;;  %2291 = vpow2.f32 %v1104_v2  ;;  %v2300_v2 = vld [vmem:[%s2792_s24 + $0x8] sm:$0xff] }
 0x2ba   : > { %v1113_v50 = vsel %vm1011_vm3, %v3166_v40, 0.0  ;;  %v2274_v49 = vpop.eup %2273  ;;  %2293 = vpow2.f32 %v1106_v11 }
 0x2bb   : > { %1168 = vperm.xlu1 %2263, %v2268_v32   ;;  %v1114_v54 = vadd.f32 %v1113_v50, %v1112_v42  ;;  %v2276_v1 = vpop.eup %2275  ;;  %v1119_v7 = vsel %vm1011_vm3, %v2274_v49, 0.0  ;;  %2295 = vpow2.f32 %v1108_v26 }
 0x2bc   : > { %v2278_v14 = vpop.eup %2277  ;;  %v1121_v20 = vsel %vm1011_vm3, %v2276_v1, 0.0  ;;  %2297 = vpow2.f32 %v1054_v9 }
 0x2bd   : > { %v1116_v58 = vadd.f32 %v1115_v48, %v1114_v54  ;;  %v2280_v23 = vpop.eup %2279  ;;  %v1123_v10 = vsel %vm1011_vm3, %v2278_v14, 0.0 }
 0x2be   : > { %v2282_v24 = vpop.eup %2281  ;;  %v1125_v17 = vsel %vm1011_vm3, %v2280_v23, 0.0 }
 0x2bf   : > { %1173 = vperm.xlu1 %2263, %v2270_v37   ;;  %v1118_v15 = vadd.f32 %v1117_v57, %v1116_v58  ;;  %v2284_v29 = vpop.eup %2283  ;;  %v1127_v28 = vsel %vm1011_vm3, %v2282_v24, 0.0 }
 0x2c0   : > { %v2286_v30 = vpop.eup %2285  ;;  %v1129_v34 = vsel %vm1011_vm3, %v2284_v29, 0.0 }
 0x2c1   : > { %v1120_v19 = vadd.f32 %v1119_v7, %v1118_v15  ;;  %v2288_v33 = vpop.eup %2287  ;;  %v1131_v36 = vsel %vm1011_vm3, %v2286_v30, 0.0 }
 0x2c2   : > { %v2290_v37 = vpop.eup %2289  ;;  %v1133_v46 = vsel %vm1011_vm3, %v2288_v33, 0.0 }
 0x2c3   : > { %1178 = vperm.xlu1 %2263, %v2274_v49   ;;  %v1122_v21 = vadd.f32 %v1121_v20, %v1120_v19  ;;  %v2292_v41 = vpop.eup %2291  ;;  %v1135_v44 = vsel %vm1011_vm3, %v2290_v37, 0.0  ;;  %v2301_v20 = vld [vmem:[%s2792_s24 + $0x10] sm:$0xff] }
 0x2c4   : > { %v2294_v45 = vpop.eup %2293  ;;  %v1137_v48 = vsel %vm1011_vm3, %v2292_v41, 0.0 }
 0x2c5   : > { %v1124_v25 = vadd.f32 %v1123_v10, %v1122_v21  ;;  %v2296_v49 = vpop.eup %2295  ;;  %v1139_v53 = vsel %vm1011_vm3, %v2294_v45, 0.0  ;;  %v2302_v21 = vld [vmem:[%s2792_s24 + $0x18] sm:$0xff] }
 0x2c6   : > { %v1141_v57 = vsel %vm1011_vm3, %v2296_v49, 0.0  ;;  %v3198_v62 = vpop.eup %2297 }
 0x2c7   : > { %1183 = vperm.xlu1 %2263, %v2276_v1   ;;  %v1126_v63 = vadd.f32 %v1125_v17, %v1124_v25  ;;  %3744 = vst [vmem:[#allocation20_spill] sm:$0xff] %v3198_v62  ;;  %v2304_v25 = vld [vmem:[%s2792_s24 + $0x48] sm:$0xff] }
 0x2c9   : > { %v1128_v32 = vadd.f32 %v1127_v28, %v1126_v63  ;;  %v2306_v28 = vld [vmem:[%s2792_s24 + $0x58] sm:$0xff] }
 0x2cb   : > { %1188 = vperm.xlu1 %2263, %v2278_v14   ;;  %v1130_v38 = vadd.f32 %v1129_v34, %v1128_v32  ;;  %v2307_v32 = vld [vmem:[%s2792_s24 + $0x60] sm:$0xff] }
 0x2cd   : > { %v1132_v42 = vadd.f32 %v1131_v36, %v1130_v38  ;;  %v2309_v36 = vld [vmem:[%s2792_s24 + $0x70] sm:$0xff] }
 0x2cf   : > { %1193 = vperm.xlu1 %2263, %v2280_v23   ;;  %v1134_v50 = vadd.f32 %v1133_v46, %v1132_v42  ;;  %v2310_v42 = vld [vmem:[%s2792_s24 + $0x78] sm:$0xff] }
 0x2d1   : > { %v1136_v54 = vadd.f32 %v1135_v44, %v1134_v50  ;;  %v2312_v44 = vld [vmem:[%s2792_s24 + $0x88] sm:$0xff] }
 0x2d3   : > { %1198 = vperm.xlu1 %2263, %v2282_v24   ;;  %v1138_v52 = vadd.f32 %v1137_v48, %v1136_v54  ;;  %v2303_v24 = vld [vmem:[%s2792_s24 + $0x40] sm:$0xff] }
 0x2d5   : > { %v1140_v58 = vadd.f32 %v1139_v53, %v1138_v52  ;;  %v2313_v52 = vld [vmem:[%s2792_s24 + $0x90] sm:$0xff] }
 0x2d7   : > { %1203 = vperm.xlu1 %2263, %v2284_v29   ;;  %v1142_v1 = vadd.f32 %v1141_v57, %v1140_v58  ;;  %v2305_v29 = vld [vmem:[%s2792_s24 + $0x50] sm:$0xff] }
 0x2d9   : > { %1143 = vadd.xlane.f32.xlu0 %v1142_v1 }
 0x2db   : > { %1213 = vperm.xlu1 %2263, %v2288_v33   ;;  %v2308_v33 = vld [vmem:[%s2792_s24 + $0x68] sm:$0xff] }
 0x2df   : > { %1223 = vperm.xlu1 %2263, %v2292_v41   ;;  %v2311_v41 = vld [vmem:[%s2792_s24 + $0x80] sm:$0xff] }
 0x2e3   : > { %1233 = vperm.xlu1 %2263, %v2296_v49  }
 0x2ef   : > { %1163 = vperm.xlu0 %2264, %v3166_v40  }
 0x2f3   : > { %1208 = vperm.xlu0 %2264, %v2286_v30  }
 0x2f7   : > { %1218 = vperm.xlu0 %2264, %v2290_v37  }
 0x2fb   : > { %1228 = vperm.xlu0 %2264, %v2294_v45  }
 0x2ff   : > { %1399 = vperm.xlu0 %2264, %v3198_v62  }
 0x336   : > { %v1159_v15 = vpop.permute.xlu1 %1158 }
 0x337   : > { %v1236_v16 = vmul.f32 %v2299_v61, %v1159_v15  ;;  %v1237_v19 = vmul.f32 %v2300_v2, %v1159_v15  ;;  %v1238_v23 = vmul.f32 %v2301_v20, %v1159_v15  ;;  %v1239_v10 = vmul.f32 %v2302_v21, %v1159_v15 }
 0x339   : > { %v3221_v54 = vsel %vm979_vm2, %v1236_v16, 0.0  ;;  %v3225_v48 = vsel %vm979_vm2, %v1237_v19, 0.0  ;;  %v3229_v49 = vsel %vm979_vm2, %v1238_v23, 0.0  ;;  %v3234_v58 = vsel %vm979_vm2, %v1239_v10, 0.0  ;;  %v2315_v23 = vld [vmem:[%s2792_s24 + $0xa0] sm:$0xff] }
 0x33a   : > { %v1169_v7 = vpop.permute.xlu1 %1168  ;;  %vm3745_vm2 = vcmp.lt.s32.totalorder %v3061_v55, 300 }
 0x33b   : > { %v1244_v26 = vmul.f32 %v2303_v24, %v1169_v7  ;;  %v1245_v17 = vmul.f32 %v2304_v25, %v1169_v7  ;;  %v1246_v63 = vmul.f32 %v2305_v29, %v1169_v7  ;;  %v1247_v30 = vmul.f32 %v2306_v28, %v1169_v7  ;;  %v2317_v24 = vld [vmem:[%s2792_s24 + $0xb0] sm:$0xff]  ;;  %vm3746_vm3 = vmmov %vm3745_vm2 }
 0x33d   : > { %v3238_v57 = vsel %vm981_vm5, %v1244_v26, 0.0  ;;  %v3242_v1 = vsel %vm981_vm5, %v1245_v17, 0.0  ;;  %v3246_v9 = vsel %vm981_vm5, %v1246_v63, 0.0  ;;  %v3250_v8 = vsel %vm981_vm5, %v1247_v30, 0.0  ;;  %v2318_v17 = vld [vmem:[%s2792_s24 + $0xb8] sm:$0xff]  ;;  %v2319_v63 = vld [vmem:[%s2792_s24 + $0xc0] sm:$0xff]  ;;  %vm3748_vm5 = vmmov %vm3745_vm2 }
 0x33e   : > { %v1174_v40 = vpop.permute.xlu1 %1173  ;;  %v2320_v30 = vld [vmem:[%s2792_s24 + $0xc8] sm:$0xff] }
 0x33f   : > { %v1248_v34 = vmul.f32 %v2307_v32, %v1174_v40  ;;  %v1249_v38 = vmul.f32 %v2308_v33, %v1174_v40  ;;  %v1250_v37 = vmul.f32 %v2309_v36, %v1174_v40  ;;  %v1251_v46 = vmul.f32 %v2310_v42, %v1174_v40  ;;  %v2314_v40 = vld [vmem:[%s2792_s24 + $0x98] sm:$0xff] }
 0x341   : > { %v3254_v15 = vsel %vm982_vm6, %v1248_v34, 0.0  ;;  %v3258_v7 = vsel %vm982_vm6, %v1249_v38, 0.0  ;;  %v3263_v2 = vsel %vm982_vm6, %v1250_v37, 0.0  ;;  %v3267_v12 = vsel %vm982_vm6, %v1251_v46, 0.0  ;;  %v2321_v38 = vld [vmem:[%s2792_s24 + $0xd0] sm:$0xff]  ;;  %v2322_v37 = vld [vmem:[%s2792_s24 + $0xd8] sm:$0xff] }
 0x342   : > { %v1179_v14 = vpop.permute.xlu1 %1178  ;;  %vm3749_vm6 = vcmp.lt.s32.totalorder %v3093_v6, 300 }
 0x343   : > { %v1252_v50 = vmul.f32 %v2311_v41, %v1179_v14  ;;  %v1253_v45 = vmul.f32 %v2312_v44, %v1179_v14  ;;  %v1254_v53 = vmul.f32 %v2313_v52, %v1179_v14  ;;  %v1255_v61 = vmul.f32 %v2314_v40, %v1179_v14  ;;  %v2324_v41 = vld [vmem:[%s2792_s24 + $0xe8] sm:$0xff]  ;;  %v2325_v44 = vld [vmem:[%s2792_s24 + $0xf0] sm:$0xff]  ;;  %v2326_v52 = vld [vmem:[%s2792_s24 + $0xf8] sm:$0xff] }
 0x345   : > { %v3271_v19 = vsel %vm983_vm7, %v1252_v50, 0.0  ;;  %v3275_v20 = vsel %vm983_vm7, %v1253_v45, 0.0  ;;  %v3279_v14 = vsel %vm983_vm7, %v1254_v53, 0.0  ;;  %v3291_v33 = vsel %vm983_vm7, %v1255_v61, 0.0  ;;  %vm3750_vm7 = vmmov %vm3749_vm6 }
 0x346   : > { %v1184_v56 = vpop.permute.xlu1 %1183 }
 0x347   : > { %v1256_v21 = vmul.f32 %v2315_v23, %v1184_v56  ;;  %v1257_v10 = vmul.f32 %v2316_v18, %v1184_v56  ;;  %v1258_v26 = vmul.f32 %v2317_v24, %v1184_v56  ;;  %v1259_v29 = vmul.f32 %v2318_v17, %v1184_v56  ;;  %v2323_v56 = vld [vmem:[%s2792_s24 + $0xe0] sm:$0xff] }
 0x348   : > { %v2327_v23 = vld [vmem:[%s2792_s24 + $0x100] sm:$0xff] }
 0x349   : > { %v3307_v40 = vsel %vm984_vm8, %v1256_v21, 0.0  ;;  %v3315_v61 = vsel %vm984_vm8, %v1258_v26, 0.0 }
 0x34a   : > { %v3201_v60 = vpop.permute.xlu1 %1188 }
 0x34b   : > { %v1260_v28 = vmul.f32 %v2319_v63, %v3201_v60  ;;  %v1261_v32 = vmul.f32 %v2320_v30, %v3201_v60  ;;  %v1262_v36 = vmul.f32 %v2321_v38, %v3201_v60  ;;  %v1263_v42 = vmul.f32 %v2322_v37, %v3201_v60  ;;  %v2330_v38 = vld [vmem:[%s2792_s24 + $0x118] sm:$0xff] }
 0x34c   : > { %v3311_v60 = vsel %vm984_vm8, %v1257_v10, 0.0 }
 0x34d   : > { %v3324_v21 = vsel %vm985_vm9, %v1260_v28, 0.0  ;;  %v3328_v10 = vsel %vm985_vm9, %v1261_v32, 0.0  ;;  %v3336_v17 = vsel %vm985_vm9, %v1263_v42, 0.0  ;;  %v2329_v32 = vld [vmem:[%s2792_s24 + $0x110] sm:$0xff]  ;;  %v2331_v42 = vld [vmem:[%s2792_s24 + $0x120] sm:$0xff] }
 0x34e   : > { %v3206_v11 = vpop.permute.xlu1 %1193 }
 0x34f   : > { %v1264_v46 = vmul.f32 %v2323_v56, %v3206_v11  ;;  %v1265_v50 = vmul.f32 %v2324_v41, %v3206_v11  ;;  %v1266_v45 = vmul.f32 %v2325_v44, %v3206_v11  ;;  %v1267_v22 = vmul.f32 %v2326_v52, %v3206_v11  ;;  %v2333_v44 = vld [vmem:[%s2792_s24 + $0x28] sm:$0xff]  ;;  %v2334_v52 = vld [vmem:[%s2792_s24 + $0x30] sm:$0xff] }
 0x350   : > { %v3320_v11 = vsel %vm984_vm8, %v1259_v29, 0.0  ;;  %v2328_v29 = vld [vmem:[%s2792_s24 + $0x108] sm:$0xff]  ;;  %vm3751_vm8 = vmmov %vm3749_vm6 }
 0x351   : > { %v3340_v27 = vsel %vm986_vm10, %v1264_v46, 0.0  ;;  %v3345_v28 = vsel %vm986_vm10, %v1265_v50, 0.0  ;;  %v3349_v30 = vsel %vm986_vm10, %v1266_v45, 0.0  ;;  %v3353_v31 = vsel %vm986_vm10, %v1267_v22, 0.0  ;;  %v2332_v50 = vld [vmem:[%s2792_s24 + $0x20] sm:$0xff] }
 0x352   : > { %v1199_v16 = vpop.permute.xlu1 %1198 }
 0x353   : > { %v1268_v18 = vmul.f32 %v2327_v23, %v1199_v16  ;;  %v1269_v63 = vmul.f32 %v2328_v29, %v1199_v16  ;;  %v2335_v23 = vld [vmem:[%s2792_s24 + $0x38] sm:$0xff] }
 0x355   : > { %v3359_v37 = vsel %vm987_vm11, %v1268_v18, 0.0  ;;  %v2336_v18 = vld [vmem:[%s2792_s24 + $0x128] sm:$0xff] }
 0x356   : > { %v1204_v24 = vpop.permute.xlu1 %1203 }
 0x357   : > { %v1272_v56 = vmul.f32 %v2331_v42, %v1204_v24  ;;  %v2338_v42 = vld [vmem:[%s2792_s24 + $0x138] sm:$0xff] }
 0x358   : > { %v1275_v62 = vmul.f32 %v2338_v42, %v1204_v24 }
 0x359   : > { %v3395_v13 = vsel %vm988_vm12, %v1272_v56, 0.0 }
 0x35a   : > { %v1214_v5 = vpop.permute.xlu1 %1213  ;;  %v3411_v56 = vsel %vm988_vm12, %v1275_v62, 0.0  ;;  %v2342_v62 = vld [vmem:[%s2792_s24 + $0x178] sm:$0xff] }
 0x366   : > { %v1144_v25 = vpop.xlane.xlu0 %1143 }
 0x367   : > { %v1145_v34 = vrot.slane %v1144_v25, 4 }
 0x369   : > { %v1146_v53 = vadd.f32 %v1145_v34, %v1144_v25  ;;  %v3332_v25 = vsel %vm985_vm9, %v1262_v36, 0.0  ;;  %v1270_v34 = vmul.f32 %v2329_v32, %v1199_v16  ;;  %v1271_v36 = vmul.f32 %v2330_v38, %v1199_v16  ;;  %v2337_v38 = vld [vmem:[%s2792_s24 + $0x130] sm:$0xff]  ;;  %vm3752_vm9 = vmmov %vm3749_vm6 }
 0x36a   : > { %v3368_v16 = vsel %vm987_vm11, %v1269_v63, 0.0  ;;  %v1273_v32 = vmul.f32 %v2336_v18, %v1204_v24  ;;  %v1274_v3 = vmul.f32 %v2337_v38, %v1204_v24  ;;  %v2340_v18 = vld [vmem:[%s2792_s24 + $0x168] sm:$0xff]  ;;  %v1283_v38 = vmul.f32 %v2342_v62, %v1214_v5 }
 0x36b   : > { %v1147_v26 = vrot.slane %v1146_v53, 2  ;;  %v2352_v62 = vld [vmem:[%s2792_s24 + $0x188] sm:$0xff] }
 0x36c   : > { %v3403_v39 = vsel %vm988_vm12, %v1273_v32, 0.0  ;;  %v2341_v32 = vld [vmem:[%s2792_s24 + $0x170] sm:$0xff] }
 0x36d   : > { %v1148_v41 = vadd.f32 %v1147_v26, %v1146_v53  ;;  %v1282_v43 = vmul.f32 %v2341_v32, %v1214_v5  ;;  %v2351_v32 = vld [vmem:[%s2792_s24 + $0x180] sm:$0xff] }
 0x36e   : > { %v1164_v46 = vpop.permute.xlu0 %1163 }
 0x36f   : > { %v1240_v35 = vmul.f32 %v2332_v50, %v1164_v46  ;;  %v1241_v45 = vmul.f32 %v2333_v44, %v1164_v46  ;;  %v1242_v22 = vmul.f32 %v2334_v52, %v1164_v46  ;;  %v1243_v29 = vmul.f32 %v2335_v23, %v1164_v46 }
 0x371   : > { %v1336_v53 = vsel %vm980_vm4, %v1240_v35, 0.0  ;;  %v1337_v26 = vsel %vm980_vm4, %v1241_v45, 0.0  ;;  %v1338_v46 = vsel %vm980_vm4, %v1242_v22, 0.0  ;;  %v1339_v63 = vsel %vm980_vm4, %v1243_v29, 0.0  ;;  %vm3747_vm4 = vmmov %vm3745_vm2 }
 0x372   : > { %v1407_v50 = vadd.f32 %v1336_v53, %v3221_v54  ;;  %v1428_v44 = vadd.f32 %v1337_v26, %v3225_v48  ;;  %v1449_v24 = vadd.f32 %v1338_v46, %v3229_v49  ;;  %v1470_v52 = vadd.f32 %v1339_v63, %v3234_v58  ;;  %v1209_v26 = vpop.permute.xlu0 %1208  ;;  %v2343_v46 = vld [vmem:[%s2792_s24 + $0x1a0] sm:$0xff]  ;;  %v2344_v63 = vld [vmem:[%s2792_s24 + $0x1a8] sm:$0xff] }
 0x373   : > { %v3387_v35 = vsel %vm987_vm11, %v1270_v34, 0.0  ;;  %v3391_v45 = vsel %vm987_vm11, %v1271_v36, 0.0  ;;  %v1149_v54 = vrot.slane %v1148_v41, 1  ;;  %v3407_v36 = vsel %vm988_vm12, %v1274_v3, 0.0 }
 0x374   : > { %v1408_v48 = vadd.f32 %v1407_v50, %v3238_v57  ;;  %v1429_v49 = vadd.f32 %v1428_v44, %v3242_v1  ;;  %v1450_v58 = vadd.f32 %v1449_v24, %v3246_v9  ;;  %v1471_v34 = vadd.f32 %v1470_v52, %v3250_v8  ;;  %v2339_v57 = vld [vmem:[%s2792_s24 + $0x160] sm:$0xff]  ;;  %v1224_v1 = vpop.permute.xlu1 %1223  ;;  %v2345_v44 = vld [vmem:[%s2792_s24 + $0x1b0] sm:$0xff]  ;;  %v2346_v52 = vld [vmem:[%s2792_s24 + $0x1b8] sm:$0xff] }
 0x375   : > { %v1280_v22 = vmul.f32 %v2339_v57, %v1214_v5  ;;  %v1281_v3 = vmul.f32 %v2340_v18, %v1214_v5  ;;  %v1150_v42 = vadd.f32 %v1149_v54, %v1148_v41  ;;  %v1289_v50 = vmul.f32 %v2344_v63, %v1224_v1  ;;  %v2350_v18 = vld [vmem:[%s2792_s24 + $0x158] sm:$0xff] }
 0x376   : > { %v1409_v9 = vadd.f32 %v1408_v48, %v3254_v15  ;;  %v1430_v8 = vadd.f32 %v1429_v49, %v3258_v7  ;;  %v1451_v23 = vadd.f32 %v1450_v58, %v3263_v2  ;;  %v1472_v29 = vadd.f32 %v1471_v34, %v3267_v12 }
 0x377   : > { %v1288_v12 = vmul.f32 %v2343_v46, %v1224_v1  ;;  %v1290_v24 = vmul.f32 %v2345_v44, %v1224_v1  ;;  %v1291_v48 = vmul.f32 %v2346_v52, %v1224_v1  ;;  %2123 = vpush %v1150_v42  ;;  %v1377_v41 = vsel %vm990_vm14, %v1281_v3, 0.0  ;;  %v2347_v1 = vld [vmem:[%s2792_s24 + $0x140] sm:$0xff]  ;;  %v2353_v42 = vld [vmem:[%s2792_s24 + $0x190] sm:$0xff] }
 0x378   : > { %v1410_v53 = vadd.f32 %v1409_v9, %v3271_v19  ;;  %v1431_v15 = vadd.f32 %v1430_v8, %v3275_v20  ;;  %v1452_v7 = vadd.f32 %v1451_v23, %v3279_v14  ;;  %v1473_v2 = vadd.f32 %v1472_v29, %v3291_v33  ;;  %v2348_v8 = vld [vmem:[%s2792_s24 + $0x148] sm:$0xff]  ;;  %v1234_v52 = vpop.permute.xlu1 %1233 }
 0x379   : > { %v1376_v33 = vsel %vm990_vm14, %v1280_v22, 0.0  ;;  %v1378_v54 = vsel %vm990_vm14, %v1282_v43, 0.0  ;;  %v1379_v49 = vsel %vm990_vm14, %v1283_v38, 0.0  ;;  %v3447_v58 = vsel %vm992_vm0, %v1288_v12, 0.0  ;;  %v1219_v22 = vpop.permute.xlu0 %1218 }
 0x37a   : > { %v1411_v5 = vadd.f32 %v1410_v53, %v3307_v40  ;;  %v1432_v19 = vadd.f32 %v1431_v15, %v3311_v60  ;;  %v1453_v20 = vadd.f32 %v1452_v7, %v3315_v61  ;;  %v1474_v14 = vadd.f32 %v1473_v2, %v3320_v11  ;;  %v2354_v15 = vld [vmem:[%s2792_s24 + $0x198] sm:$0xff] }
 0x37b   : > { %v3451_v34 = vsel %vm992_vm0, %v1289_v50, 0.0  ;;  %v3455_v51 = vsel %vm992_vm0, %v1290_v24, 0.0  ;;  %v1276_v9 = vmul.f32 %v2347_v1, %v1209_v26  ;;  %v1277_v23 = vmul.f32 %v2348_v8, %v1209_v26  ;;  %v2361_v8 = vld [vmem:[%s2792_s24 + $0x1f0] sm:$0xff] }
 0x37c   : > { %v1412_v40 = vadd.f32 %v1411_v5, %v3324_v21  ;;  %v1433_v60 = vadd.f32 %v1432_v19, %v3328_v10  ;;  %v1454_v61 = vadd.f32 %v1453_v20, %v3332_v25  ;;  %v1475_v11 = vadd.f32 %v1474_v14, %v3336_v17  ;;  %v2355_v14 = vld [vmem:[%s2792_s24 + $0x1c0] sm:$0xff] }
 0x37d   : > { %v3459_v21 = vsel %vm992_vm0, %v1291_v48, 0.0  ;;  %v1278_v29 = vmul.f32 %v2349_v59, %v1209_v26  ;;  %v1279_v3 = vmul.f32 %v2350_v18, %v1209_v26  ;;  %v1284_v43 = vmul.f32 %v2351_v32, %v1219_v22 }
 0x37e   : > { %v1413_v10 = vadd.f32 %v1412_v40, %v3340_v27  ;;  %v1434_v25 = vadd.f32 %v1433_v60, %v3345_v28  ;;  %v1455_v17 = vadd.f32 %v1454_v61, %v3349_v30  ;;  %v1476_v57 = vadd.f32 %v1475_v11, %v3353_v31  ;;  %v2356_v60 = vld [vmem:[%s2792_s24 + $0x1c8] sm:$0xff]  ;;  %v2357_v11 = vld [vmem:[%s2792_s24 + $0x1d0] sm:$0xff] }
 0x37f   : > { %v1285_v38 = vmul.f32 %v2352_v62, %v1219_v22  ;;  %v1286_v53 = vmul.f32 %v2353_v42, %v1219_v22  ;;  %v1287_v7 = vmul.f32 %v2354_v15, %v1219_v22  ;;  %v1374_v46 = vsel %vm989_vm13, %v1278_v29, 0.0 }
 0x380   : > { %v1414_v27 = vadd.f32 %v1413_v10, %v3359_v37  ;;  %v1435_v28 = vadd.f32 %v1434_v25, %v3368_v16  ;;  %v1456_v30 = vadd.f32 %v1455_v17, %v3387_v35  ;;  %v1477_v31 = vadd.f32 %v1476_v57, %v3391_v45  ;;  %v2358_v25 = vld [vmem:[%s2792_s24 + $0x1d8] sm:$0xff] }
 0x381   : > { %v1372_v35 = vsel %vm989_vm13, %v1276_v9, 0.0  ;;  %v1373_v45 = vsel %vm989_vm13, %v1277_v23, 0.0  ;;  %v1375_v12 = vsel %vm989_vm13, %v1279_v3, 0.0  ;;  %v1380_v50 = vsel %vm3745_vm2, %v1284_v43, 0.0  ;;  %v2362_v23 = vld [vmem:[%s2792_s24 + $0x1f8] sm:$0xff] }
 0x382   : > { %v1415_v2 = vadd.f32 %v1414_v27, %v3395_v13  ;;  %v1436_v26 = vadd.f32 %v1435_v28, %v3403_v39  ;;  %v1457_v37 = vadd.f32 %v1456_v30, %v3407_v36  ;;  %v1478_v16 = vadd.f32 %v1477_v31, %v3411_v56  ;;  %v1229_v56 = vpop.permute.xlu0 %1228 }
 0x383   : > { %v1381_v44 = vsel %vm3746_vm3, %v1285_v38, 0.0  ;;  %v1382_v24 = vsel %vm3747_vm4, %v1286_v53, 0.0  ;;  %v1383_v47 = vsel %vm3748_vm5, %v1287_v7, 0.0  ;;  %v1292_v40 = vmul.f32 %v2355_v14, %v1229_v56 }
 0x384   : > { %v1416_v13 = vadd.f32 %v1415_v2, %v1372_v35  ;;  %v1437_v39 = vadd.f32 %v1436_v26, %v1373_v45  ;;  %v1458_v63 = vadd.f32 %v1457_v37, %v1374_v46  ;;  %v1479_v36 = vadd.f32 %v1478_v16, %v1375_v12 }
 0x385   : > { %v1293_v61 = vmul.f32 %v2356_v60, %v1229_v56  ;;  %v1294_v10 = vmul.f32 %v2357_v11, %v1229_v56  ;;  %v1295_v17 = vmul.f32 %v2358_v25, %v1229_v56  ;;  %v1299_v59 = vmul.f32 %v2362_v23, %v1234_v52  ;;  %v1110_v23 = vld [vmem:[#allocation3] sm:$0x1] }
 0x386   : > { %v1417_v48 = vadd.f32 %v1416_v13, %v1376_v33  ;;  %v1438_v5 = vadd.f32 %v1437_v39, %v1377_v41  ;;  %v1459_v19 = vadd.f32 %v1458_v63, %v1378_v54  ;;  %v1480_v20 = vadd.f32 %v1479_v36, %v1379_v49  ;;  %v2359_v33 = vld [vmem:[%s2792_s24 + $0x1e0] sm:$0xff]  ;;  %v2360_v41 = vld [vmem:[%s2792_s24 + $0x1e8] sm:$0xff] }
 0x387   : > { %v1296_v9 = vmul.f32 %v2359_v33, %v1234_v52  ;;  %v1297_v54 = vmul.f32 %v2360_v41, %v1234_v52  ;;  %v1298_v49 = vmul.f32 %v2361_v8, %v1234_v52  ;;  %v1388_v28 = vsel %vm993_vm1, %v1292_v40, 0.0  ;;  %v1396_v33 = vld [vmem:[#allocation4] sm:$0xf] }
 0x388   : > { %v1418_v57 = vadd.f32 %v1417_v48, %v1380_v50  ;;  %v1439_v55 = vadd.f32 %v1438_v5, %v1381_v44  ;;  %v1460_v22 = vadd.f32 %v1459_v19, %v1382_v24  ;;  %v1481_v1 = vadd.f32 %v1480_v20, %v1383_v47 }
 0x389   : > { %v1389_v30 = vsel %vm993_vm1, %v1293_v61, 0.0  ;;  %v1390_v31 = vsel %vm993_vm1, %v1294_v10, 0.0  ;;  %v1391_v32 = vsel %vm993_vm1, %v1295_v17, 0.0  ;;  %v1394_v38 = vsel %vm3751_vm8, %v1298_v49, 0.0  ;;  %v1400_v10 = vpop.permute.xlu0 %1399 }
 0x38a   : > { %v1419_v29 = vadd.f32 %v1418_v57, %v3447_v58  ;;  %v1440_v18 = vadd.f32 %v1439_v55, %v3451_v34  ;;  %v1461_v3 = vadd.f32 %v1460_v22, %v3455_v51  ;;  %v1482_v27 = vadd.f32 %v1481_v1, %v3459_v21  ;;  %v3753_v22 = vld [vmem:[#allocation19_spill] sm:$0xff] }
 0x38b   : > { %v1392_v51 = vsel %vm3749_vm6, %v1296_v9, 0.0  ;;  %v1393_v21 = vsel %vm3750_vm7, %v1297_v54, 0.0  ;;  %v1395_v42 = vsel %vm3752_vm9, %v1299_v59, 0.0  ;;  %v2621_v35 = vmov 1966171168   ;;  %v3757_v59 = vld [vmem:[#allocation20_spill] sm:$0xff] }
 0x38c   : > { %v1420_v43 = vadd.f32 %v1419_v29, %v1388_v28  ;;  %v1441_v58 = vadd.f32 %v1440_v18, %v1389_v30  ;;  %v1462_v62 = vadd.f32 %v1461_v3, %v1390_v31  ;;  %v1483_v34 = vadd.f32 %v1482_v27, %v1391_v32  ;;  %v1545_v30 = vld [vmem:[#allocation2] sm:$0x1] (!%p1931_p7) }
 0x38d   : > { %v1498_v45 = vunpack.c.l.s4 %v2621_v35  ;;  %v1405_v1 = vrot.slane %v1400_v10, %v3753_v22  ;;  %v3754_v8 = vlaneseq  ;;  %v1111_v29 = vmul.f32 %v3757_v59, %v1110_v23  ;;  %1546 = vst.msk [vmem:[#allocation12] sm:$0x1] (!%p1931_p7), %vm1154_vm15, %v1545_v30 }
 0x38e   : > { %v1421_v53 = vadd.f32 %v1420_v43, %v1392_v51  ;;  %v1442_v15 = vadd.f32 %v1441_v58, %v1393_v21  ;;  %v1463_v0 = vadd.f32 %v1462_v62, %v1394_v38  ;;  %v1484_v7 = vadd.f32 %v1483_v34, %v1395_v42  ;;  %v3758_v43 = vld [vmem:[#allocation19_spill] sm:$0xff] (!%p1931_p7) }
 0x38f   : > { %v1499_v6 = vunpack.c.0.s8 %v1498_v45  ;;  %v1406_v54 = vmul.f32 %v1405_v1, %v1396_v33  ;;  %vm3528_vm10 = vcmp.lt.s32.totalorder %v3754_v8, 512  ;;  %v2622_v28 = vmov (!%p1931_p7), 0  }
 0x390   : > { %v1422_v2 = vrot.slane %v1421_v53, 4  ;;  %v1443_v26 = vrot.slane %v1442_v15, 4  ;;  %v1464_v37 = vrot.slane %v1463_v0, 4  ;;  %v1485_v16 = vrot.slane %v1484_v7, 4  ;;  %2363 = vset.pattern.permute.xlu0 (!%p1931_p7), %v2622_v28 }
 0x391   : > { %v1502_v14 = vsub.s32 %v1499_v6, %v2871_v4 }
 0x392   : > { %v1423_v46 = vadd.f32 %v1422_v2, %v1421_v53  ;;  %v1444_v12 = vadd.f32 %v1443_v26, %v1442_v15  ;;  %v1465_v13 = vadd.f32 %v1464_v37, %v1463_v0  ;;  %v1486_v39 = vadd.f32 %v1485_v16, %v1484_v7 }
 0x394   : > { %v1424_v63 = vrot.slane %v1423_v46, 2  ;;  %v1445_v36 = vrot.slane %v1444_v12, 2  ;;  %v1466_v56 = vrot.slane %v1465_v13, 2  ;;  %v1487_v50 = vrot.slane %v1486_v39, 2 }
 0x396   : > { %v1425_v44 = vadd.f32 %v1424_v63, %v1423_v46  ;;  %v1446_v24 = vadd.f32 %v1445_v36, %v1444_v12  ;;  %v1467_v47 = vadd.f32 %v1466_v56, %v1465_v13  ;;  %v1488_v52 = vadd.f32 %v1487_v50, %v1486_v39 }
 0x398   : > { %v1426_v48 = vrot.slane %v1425_v44, 1  ;;  %v1447_v5 = vrot.slane %v1446_v24, 1  ;;  %v1468_v19 = vrot.slane %v1467_v47, 1  ;;  %v1489_v20 = vrot.slane %v1488_v52, 1 }
 0x39a   : > { %v1427_v40 = vadd.f32 %v1426_v48, %v1425_v44  ;;  %v1448_v60 = vadd.f32 %v1447_v5, %v1446_v24  ;;  %v1469_v61 = vadd.f32 %v1468_v19, %v1467_v47  ;;  %v1490_v11 = vadd.f32 %v1489_v20, %v1488_v52 }
 0x39c   : > { %v1495_v25 = vcombine.low %v1427_v40, %v1448_v60  ;;  %v1496_v17 = vcombine.low %v1469_v61, %v1490_v11 }
 0x39e   : > { %v1503_v57 = vrot.slane %v1495_v25, %v1502_v14  ;;  %v1510_v55 = vrot.slane %v1496_v17, %v1502_v14 }
 0x3a0   : > { %v1511_v9 = vcombine.low %v1503_v57, %v1510_v55 }
 0x3a2   : > { %v1518_v41 = vrot.slane %v1511_v9, %v1502_v14 }
 0x3a4   : > { %v1520_v4 = vadd.f32 %v1518_v41, %v1406_v54 }
 0x3a6   : > { %1525 = vst.msk [vmem:[#allocation4] sm:$0xf] %vm3528_vm10, %v1520_v4  ;;  %1530 = sbr.rel (%p1931_p7) target bundleno = 1092 (0x444), region = 48 }
 0x3a8   : > { %s2124_s14 = spop %2123 }
 0x3a9   : > { %v1152_v18 = vstv %s2124_s14 }
 0x3aa   : > { %v1153_v3 = vadd.f32 %v1152_v18, %v1111_v29 }
 0x3ac   : > { %1155 = vst.msk [vmem:[#allocation3] sm:$0x1] %vm1154_vm15, %v1153_v3 }
 0x3ad   : > { %v1531_v62 = vld [vmem:[#allocation4] sm:$0xf] }
 0x3b3   : > { %v1532_v27 = vld [vmem:[#allocation3] sm:$0x1] }
 0x3b4   : > { %1535 = vperm.xlu0 %2363, %v1532_v27   ;;  %v1547_v31 = vld [vmem:[#allocation3] sm:$0x1] }
 0x3b5   : > { %1548 = vst.msk [vmem:[#allocation14] sm:$0x1] %vm1154_vm15, %v1547_v31 }
 0x433   : > { %v1536_v32 = vpop.permute.xlu0 %1535 }
 0x434   : > { %v1541_v58 = vrot.slane %v1536_v32, %v3758_v43 }
 0x436   : > { %2364 = vrcp.f32 %v1541_v58 }
 0x440   : > { %v2365_v34 = vpop.eup %2364 }
 0x441   : > { %v1543_v51 = vmul.f32 %v2365_v34, %v1531_v62 }
 0x443   : > { %1544 = vst.msk [vmem:[#allocation10] sm:$0xf] %vm3528_vm10, %v1543_v51 }
 0x444 PF: > { %s2623_s15 = smov [#allocation10]   ;;  %p3759_p13 = scmp.eq.s32.totalorder %s2680_s25, 2 }
 0x445   : > { %s1560_s16 = sshll.u32 %s2623_s15, 4  ;;  %s1561_s16 = int_to_ptr.vmem [resolvable:$true] %s1560_s16 }
 0x446   : > { %s2422_s12 = scalar_lea.vmem %s1561_s16, 64  ;;  %p2429_p4 = scmp.lt.s32.totalorder %s1561_s16, %s1561_s16 }
 0x447   : > { %p2423_p9 = scmp.ne.s32.totalorder %s1561_s16, %s2422_s12  ;;  %p2430_p6 = scmp.lt.s32.totalorder %s2422_s12, %s2422_s12 }
 0x449   : > { %p2424_p1 = pnand %p2423_p9, %p3759_p13  ;;  %p2431_p8 = por %p2430_p6, %p2429_p4 }
 0x44b   : > { %p2425_p3 = pneg %p2424_p1 }
 0x44d   : > { %p2432_p11 = pnand %p2431_p8, %p2425_p3 }
 0x44f   : > { %2435 = shalt.err (!%p2432_p11)
}
 0x450   : > { %s2436_s19 = scalar_lea.hbm %s3719_s3, 64  ;;  %p3760_p12 = pmov %p3759_p13 }
 0x451   : > { %p2437_p10 = scmp.ne.s32.totalorder %s3719_s3, %s2436_s19  ;;  %p2442_p2 = scmp.lt.u32.totalorder %s2436_s19, %s3719_s3 }
 0x453   : > { %p2438_p0 = pnand %p2437_p10, %p3760_p12 }
 0x455   : > { %p2439_p5 = pneg %p2438_p0 }
 0x457   : > { %p2444_p7 = pnand %p2442_p2, %p2439_p5 }
 0x459   : > { %2447 = shalt.err (!%p2444_p7)
}
 0x45a   : > { %p3761_p9 = pmov %p3760_p12  ;;  %p3762_p13 = scmp.ne.s32.totalorder %s3734_s8, 0 }
 0x45b   : > { %s1934_s7 = sshll.u32 (%p3762_p13), %s2680_s25, 4  ;;  %s3568_s14 = scalar_lea.vmem (%p3762_p13), %s3720_s4, %s1930_s21  }
 0x45c   : > { %2131 = dma.vmem_to_hbm [thread:$0]  (%p3761_p9), %s1561_s16, 64, %s3719_s3, [#allocation7]  }
 0x45d   : > { %1566 = sbr.rel (!%p3762_p13) target bundleno = 1173 (0x495), region = 56  ;;  %s1568_s15 = ssub.s32 (%p3762_p13), 38, %s1934_s7 }
 0x45e   : > { %p1569_p1 = scmp.lt.s32.totalorder (%p3762_p13), %s1568_s15, 16 }
 0x464   : > { %s3782_s15 = smov (!%p1569_p1, %s1568_s15), 16 }
 0x465   : > { %s1935_s12 = sshll.u32 %s3782_s15, 7 }
 0x466   : > { %p1938_p3 = scmp.eq.s32.totalorder %s1935_s12, 0 }
 0x467   : > { %s3574_s8 = sshrl.u32 (!%p1938_p3), %s3782_s15, 4 }
 0x468   : > { %1577 = sbr.rel (%p1938_p3) target bundleno = 1173 (0x495), region = 60  ;;  %p1939_p4 = scmp.le.s32.totalorder (!%p1938_p3), %s3574_s8, 0 }
 0x46f   : > { %1838 = sbr.rel (%p1939_p4) target bundleno = 1152 (0x480), region = 163  ;;  %s3763_s16 = smov (!%p1939_p4), %s3568_s14 }
 0x470   : > { %s3764_s21 = smov (!%p1939_p4), %s2802_s17  ;;  %s3583_s11 = smov (!%p1939_p4), 0  }
 0x471   : > { %s3585_s30 = smov (!%p1939_p4), 0  }
 0x476 LB: >> { %v1669_v21 = vld [vmem:[%s2586_s21] sm:$0xff]  ;;  %v1671_v38 = vld [vmem:[%s2586_s21 + $0x8] sm:$0xff]  ;;  %v1673_v42 = vld [vmem:[%s2586_s21 + $0x10] sm:$0xff]  ;;  %s1701_s19 = sadd.s32 1, %s2590_s11  ;;  %s1663_s30 = sadd.s32 1, %s2594_s30   ;;  %s2594_s30 = sphi %s3585_s30, %s1663_s30   ;;  %s2590_s11 = sphi %s3583_s11, %s3765_s11   ;;  %s2586_s21 = sphi %s3764_s21, %s1706_s21   ;;  %s2582_s16 = sphi %s3763_s16, %s1707_s16  }
 0x477   : >> { %1670 = vst [vmem:[%s2582_s16] sm:$0xff] %v1669_v21  ;;  %1672 = vst [vmem:[%s2582_s16 + $0x8] sm:$0xff] %v1671_v38  ;;  %v1675_v53 = vld [vmem:[%s2586_s21 + $0x18] sm:$0xff]  ;;  %v1677_v15 = vld [vmem:[%s2586_s21 + $0x20] sm:$0xff]  ;;  %p1702_p6 = scmp.ge.s32.totalorder %s1701_s19, %s3574_s8  ;;  %p1662_p8 = scmp.ge.s32.totalorder %s1663_s30, %s3574_s8 }
 0x478   : >> { %1674 = vst [vmem:[%s2582_s16 + $0x10] sm:$0xff] %v1673_v42  ;;  %v1679_v0 = vld [vmem:[%s2586_s21 + $0x28] sm:$0xff]  ;;  %1676 = vst [vmem:[%s2582_s16 + $0x18] sm:$0xff] %v1675_v53  ;;  %v1681_v7 = vld [vmem:[%s2586_s21 + $0x30] sm:$0xff] }
 0x479   : >> { %1678 = vst [vmem:[%s2582_s16 + $0x20] sm:$0xff] %v1677_v15  ;;  %1680 = vst [vmem:[%s2582_s16 + $0x28] sm:$0xff] %v1679_v0  ;;  %v1683_v2 = vld [vmem:[%s2586_s21 + $0x38] sm:$0xff]  ;;  %v1685_v26 = vld [vmem:[%s2586_s21 + $0x40] sm:$0xff]  ;;  %s3784_s19 = smov (%p1702_p6, %s1701_s19), 0  ;;  %1665 = sbr.rel (!%p1662_p8) target bundleno = 1142 (0x476), region = 169 }
 0x47a   : >> { %1682 = vst [vmem:[%s2582_s16 + $0x30] sm:$0xff] %v1681_v7  ;;  %1684 = vst [vmem:[%s2582_s16 + $0x38] sm:$0xff] %v1683_v2  ;;  %v1687_v37 = vld [vmem:[%s2586_s21 + $0x48] sm:$0xff]  ;;  %v1689_v16 = vld [vmem:[%s2586_s21 + $0x50] sm:$0xff]  ;;  %s1940_s20 = sshll.u32 %s3784_s19, 7  ;;  %s3765_s11 = smov %s3784_s19 }
 0x47b   : >> { %1686 = vst [vmem:[%s2582_s16 + $0x40] sm:$0xff] %v1685_v26  ;;  %v1691_v35 = vld [vmem:[%s2586_s21 + $0x58] sm:$0xff]  ;;  %1688 = vst [vmem:[%s2582_s16 + $0x48] sm:$0xff] %v1687_v37  ;;  %v1693_v45 = vld [vmem:[%s2586_s21 + $0x60] sm:$0xff] }
 0x47c   : >> { %1690 = vst [vmem:[%s2582_s16 + $0x50] sm:$0xff] %v1689_v16  ;;  %1692 = vst [vmem:[%s2582_s16 + $0x58] sm:$0xff] %v1691_v35  ;;  %v1695_v46 = vld [vmem:[%s2586_s21 + $0x68] sm:$0xff]  ;;  %v1697_v12 = vld [vmem:[%s2586_s21 + $0x70] sm:$0xff] }
 0x47d   : >> { %1694 = vst [vmem:[%s2582_s16 + $0x60] sm:$0xff] %v1693_v45  ;;  %1696 = vst [vmem:[%s2582_s16 + $0x68] sm:$0xff] %v1695_v46  ;;  %v1699_v13 = vld [vmem:[%s2586_s21 + $0x78] sm:$0xff]  ;;  %s1706_s21 = scalar_lea.vmem %s2802_s17, %s1940_s20 [#allocation11]  }
 0x47e   : >> { %1698 = vst [vmem:[%s2582_s16 + $0x70] sm:$0xff] %v1697_v12  ;;  %1700 = vst [vmem:[%s2582_s16 + $0x78] sm:$0xff] %v1699_v13  ;;  %s1707_s16 = scalar_lea.vmem %s3568_s14, %s1940_s20  }
 0x480 PF: > { %s3643_s28 = sand.u32 15, %s3782_s15   ;;  %s1959_s10 = sshll.u32 %s3574_s8, 7 }
 0x481   : > { %s1712_s13 = scalar_lea.vmem %s2802_s17, %s1959_s10 [#allocation11]   ;;  %s1714_s24 = scalar_lea.vmem %s3568_s14, %s1959_s10  }
 0x482   : > { %p1945_p11 = scmp.le.s32.totalorder %s3643_s28, 0 }
 0x483   : > { %s2596_s9 = smov (!%p1945_p11), %s1714_s24   ;;  %s2600_s7 = smov (!%p1945_p11), %s1712_s13  }
 0x484   : > { %1852 = sbr.rel (%p1945_p11) target bundleno = 1173 (0x495), region = 174  ;;  %s2604_s18 = smov (!%p1945_p11), 0  }
 0x485   : > { %s2608_s27 = smov (!%p1945_p11), 0  }
 0x48b LB: >> { %v1724_v39 = vld [vmem:[%s2602_s7] sm:$0xff]  ;;  %s1726_s15 = sadd.s32 1, %s2606_s18  ;;  %s1718_s27 = sadd.s32 1, %s2610_s27   ;;  %s2610_s27 = sphi %s2608_s27, %s1718_s27   ;;  %s2606_s18 = sphi %s2604_s18, %s2605_s18   ;;  %s2602_s7 = sphi %s2600_s7, %s1731_s7   ;;  %s2598_s9 = sphi %s2596_s9, %s1732_s9  }
 0x48c   : >> { %1725 = vst [vmem:[%s2598_s9] sm:$0xff] %v1724_v39  ;;  %p1727_p10 = scmp.ge.s32.totalorder %s1726_s15, %s3643_s28  ;;  %p1717_p12 = scmp.ge.s32.totalorder %s1718_s27, %s3643_s28 }
 0x48e   : >> { %s3786_s15 = smov (%p1727_p10, %s1726_s15), 0  ;;  %1720 = sbr.rel (!%p1717_p12) target bundleno = 1163 (0x48b), region = 180 }
 0x48f   : >> { %s1946_s17 = sshll.u32 %s3786_s15, 3  ;;  %s2605_s18 = smov %s3786_s15  }
 0x490   : >> { %s1731_s7 = scalar_lea.vmem %s1712_s13, %s1946_s17 [#allocation11]   ;;  %s1732_s9 = scalar_lea.vmem %s1714_s24, %s1946_s17  }
 0x495 PF: > { %s2624_s14 = smov [#allocation12]   ;;  %s2625_s8 = smov [#allocation14]  }
 0x496   : > { %s1743_s12 = sshll.u32 %s2624_s14, 4  ;;  %s1754_s16 = sshll.u32 %s2625_s8, 4  ;;  %s1744_s12 = int_to_ptr.vmem [resolvable:$true] %s1743_s12  ;;  %s3651_s16 = int_to_ptr.vmem [resolvable:$true] %s1754_s16 }
 0x497   : > { %s2448_s21 = scalar_lea.vmem %s1744_s12, 16  ;;  %p3766_p5 = scmp.eq.s32.totalorder %s2680_s25, 2 }
 0x498   : > { %p2449_p0 = scmp.ne.s32.totalorder %s1744_s12, %s2448_s21  ;;  %s2454_s11 = scalar_lea.vmem %s1744_s12, 32 }
 0x499   : > { %p2455_p9 = scmp.lt.s32.totalorder %s1744_s12, %s1744_s12  ;;  %p2456_p13 = scmp.lt.s32.totalorder %s2454_s11, %s2448_s21 }
 0x49a   : > { %p2450_p2 = pnand %p2449_p0, %p3766_p5 }
 0x49b   : > { %p2457_p1 = por %p2456_p13, %p2455_p9 }
 0x49c   : > { %p2451_p7 = pneg %p2450_p2 }
 0x49e   : > { %p2458_p3 = pnand %p2457_p1, %p2451_p7 }
 0x4a0   : > { %2461 = shalt.err (!%p2458_p3)
}
 0x4a1   : > { %s2462_s20 = scalar_lea.hbm %s3721_s5, 16  ;;  %p3767_p6 = pmov %p3766_p5 }
 0x4a2   : > { %p2463_p4 = scmp.ne.s32.totalorder %s3721_s5, %s2462_s20  ;;  %p2468_p10 = scmp.lt.u32.totalorder %s2462_s20, %s3721_s5 }
 0x4a4   : > { %p2464_p8 = pnand %p2463_p4, %p3767_p6 }
 0x4a6   : > { %p2465_p11 = pneg %p2464_p8 }
 0x4a8   : > { %p2470_p12 = pnand %p2468_p10, %p2465_p11 }
 0x4aa   : > { %2473 = shalt.err (!%p2470_p12)
}
 0x4ab   : > { %p3768_p0 = pmov %p3766_p5  ;;  %s2474_s18 = scalar_lea.vmem %s3651_s16, 16 }
 0x4ac   : > { %p2475_p5 = scmp.ne.s32.totalorder %s3651_s16, %s2474_s18  ;;  %s2480_s27 = scalar_lea.vmem %s3651_s16, 32 }
 0x4ad   : > { %2133 = dma.vmem_to_hbm [thread:$0]  (%p3768_p0), %s1744_s12, 16, %s3721_s5, [#allocation13]  }
 0x4ae   : > { %p3769_p2 = pmov %p3768_p0  ;;  %p2481_p13 = scmp.lt.s32.totalorder %s3651_s16, %s3651_s16 }
 0x4af   : > { %p2482_p1 = scmp.lt.s32.totalorder %s2480_s27, %s2474_s18 }
 0x4b0   : > { %p2476_p7 = pnand %p2475_p5, %p3769_p2 }
 0x4b1   : > { %p2483_p3 = por %p2482_p1, %p2481_p13 }
 0x4b2   : > { %p2477_p9 = pneg %p2476_p7 }
 0x4b4   : > { %p2484_p4 = pnand %p2483_p3, %p2477_p9 }
 0x4b6   : > { %2487 = shalt.err (!%p2484_p4)
}
 0x4b7   : > { %s2488_s14 = scalar_lea.hbm %s3722_s6, 16  ;;  %p3770_p8 = pmov %p3768_p0 }
 0x4b8   : > { %p2489_p6 = scmp.ne.s32.totalorder %s3722_s6, %s2488_s14  ;;  %p2494_p12 = scmp.lt.u32.totalorder %s2488_s14, %s3722_s6 }
 0x4ba   : > { %p2490_p11 = pnand %p2489_p6, %p3770_p8 }
 0x4bc   : > { %p2491_p10 = pneg %p2490_p11 }
 0x4be   : > { %p2496_p0 = pnand %p2494_p12, %p2491_p10 }
 0x4c0   : > { %2499 = shalt.err (!%p2496_p0)
}
 0x4c1   : > { %p3771_p5 = pmov %p3769_p2 }
 0x4c3   : > { %2135 = dma.vmem_to_hbm [thread:$0]  (%p3771_p5), %s3651_s16, 16, %s3722_s6, [#allocation13]  }
 0x4c4   : > { %2557 = dma.done.wait (%p3769_p2), [#allocation7], 64   ;;  %p3772_p7 = pmov %p3769_p2 }
 0x4c5   : > { %p3773_p9 = pmov %p3769_p2 }
 0x4c6   : > { %2559 = vsyncadd (%p3772_p7), [#allocation7], 4294967232 }
 0x4c7   : > { %2561 = dma.done.wait (%p3773_p9), [#allocation13], 32   ;;  %p3774_p13 = pmov %p3769_p2 }
 0x4c9   : > { %2563 = vsyncadd (%p3774_p13), [#allocation13], 4294967264 }
 0x4ca PF: > { %p20_p1 = scmp.ge.s32.totalorder %s2683_s26, 5   ;;  %s3775_s21 = smov %s2570_s22 }
 0x4cb   : > { %s3776_s22 = smov %s2574_s23  ;;  %s3777_s23 = smov %s2693_s29 }
 0x4cc   : > { %s3778_s24 = smov %s2683_s26  ;;  %22 = sbr.rel (!%p20_p1) target bundleno = 6 (0x6), region = 191 }
 0x4d3   :  { %1782 = vsyncpa [#allocation6], 1 }
 0x4d4   :  { %1784 = vsyncpa [#allocation6 + $0x1], 1 }
 0x4d5   :  { %1785 = vsyncpa [#allocation9], 1 }
 0x4d6   :  { %1786 = vsyncpa [#allocation7], 1 }
 0x4d7   :  { %1788 = vsyncpa [#allocation7 + $0x1], 1 }
 0x4d8   :  { %1789 = vsyncpa [#allocation13], 1 }

</bundles_post_ra>
